<compile_context>
chip_gen: v7x
topology: tpu7x:2x2x1
jax: 0.10.0
libtpu: 0.0.40
codegen_flags: <defaults>
</compile_context>

<pallas_src>
import math
import functools

import jax
import jax.numpy as jnp
from jax import lax
from jax.experimental import pallas as pl
from jax.experimental.pallas import tpu as pltpu

D_FF = 512
N_HEAD = 4
N_LAYERS = 6
LN_EPS = 1e-5
NEG_BIG = -1e30          # large finite negative (avoids inf-inf=NaN on masked rows)
LANE = 128


def _layer_norm(v, g, b):
    mu = jnp.mean(v, axis=-1, keepdims=True)
    var = jnp.mean(jnp.square(v - mu), axis=-1, keepdims=True)
    return (v - mu) * lax.rsqrt(var + LN_EPS) * g + b


def fused_decoder_kernel(x_ref,
                         wqkv_ref, bqkv_ref, wo_ref, ob_ref, ca_ref,
                         w1_ref, b1_ref, w2_ref, b2_ref,
                         n1g_ref, n1b_ref, n2g_ref, n2b_ref, n3g_ref, n3b_ref,
                         fcw_ref, fcb_ref,
                         out_ref,
                         *, nhead, num_layers):
    """One batch element per grid step. x_ref: (S, D) f32; out_ref: (S, V_pad) f32."""
    x = x_ref[...].astype(jnp.float32)                         # (S, D)
    seq, d_model = x.shape
    dh = d_model // nhead
    scale = jnp.float32(1.0 / math.sqrt(dh))

    # Causal mask from skinny iotas (broadcast compare; no (S,S) int temporaries).
    row = lax.broadcasted_iota(jnp.int32, (seq, 1), 0)
    col = lax.broadcasted_iota(jnp.int32, (1, seq), 1)
    allowed = col <= row                                        # (S, S) bool

    def layer_body(l, x):
        # ---------------- self-attention (post-norm), fused QKV ----------------
        qkv = jnp.dot(x.astype(jnp.bfloat16), wqkv_ref[l],
                      preferred_element_type=jnp.float32) + bqkv_ref[l]   # (S, 3D)
        heads = []
        for h in range(nhead):                                  # static unroll (H=4)
            q = qkv[:, h * dh:(h + 1) * dh]
            k = qkv[:, d_model + h * dh:d_model + (h + 1) * dh]
            v = qkv[:, 2 * d_model + h * dh:2 * d_model + (h + 1) * dh]
            s = lax.dot_general(q.astype(jnp.bfloat16), k.astype(jnp.bfloat16),
                                (((1,), (1,)), ((), ())),
                                preferred_element_type=jnp.float32) * scale
            s = jnp.where(allowed, s, NEG_BIG)
            s = s - jnp.max(s, axis=-1, keepdims=True)
            p = jnp.exp(s)
            p = p * pl.reciprocal(jnp.sum(p, axis=-1, keepdims=True), approx=True)
            heads.append(jnp.dot(p.astype(jnp.bfloat16), v.astype(jnp.bfloat16),
                                 preferred_element_type=jnp.float32))
        o = jnp.concatenate(heads, axis=-1)                     # (S, D) lane-contiguous
        attn = jnp.dot(o.astype(jnp.bfloat16), wo_ref[l],
                       preferred_element_type=jnp.float32) + ob_ref[l]
        x = _layer_norm(x + attn, n1g_ref[l], n1b_ref[l])

        # ------- cross-attention vs. zero memory == per-layer constant vector -------
        x = _layer_norm(x + ca_ref[l], n2g_ref[l], n2b_ref[l])

        # ---------------- feed-forward ----------------
        hid = jnp.dot(x.astype(jnp.bfloat16), w1_ref[l],
                      preferred_element_type=jnp.float32) + b1_ref[l]
        hid = jnp.maximum(hid, 0.0)
        ff = jnp.dot(hid.astype(jnp.bfloat16), w2_ref[l],
                     preferred_element_type=jnp.float32) + b2_ref[l]
        return _layer_norm(x + ff, n3g_ref[l], n3b_ref[l])

    x = lax.fori_loop(0, num_layers, layer_body, x)

    # ---------------- lane-dense final vocab projection (V padded to 128) ----------------
    out_ref[...] = jnp.dot(x.astype(jnp.bfloat16), fcw_ref[...],
                           preferred_element_type=jnp.float32) + fcb_ref[...]


def init_params(key, vocab_size, d_model, nhead=N_HEAD, d_ff=D_FF, num_layers=N_LAYERS):
    """Parameters in PyTorch-equivalent layout (in_proj (3D,D), out_proj (D,D), ...)."""
    keys = iter(jax.random.split(key, 16 * num_layers + 8))

    def w(shape, scale=0.05):
        return (scale * jax.random.normal(next(keys), shape)).astype(jnp.float32)

    D = d_model
    params = {
        "embedding": w((vocab_size, D), 1.0),
        "fc_w": w((vocab_size, D)),
        "fc_b": w((1, vocab_size)),
        "layers": [],
    }
    for _ in range(num_layers):
        params["layers"].append({
            "sa_w": w((3 * D, D)), "sa_b": w((1, 3 * D)),
            "sa_ow": w((D, D)), "sa_ob": w((1, D)),
            "ca_w": w((3 * D, D)), "ca_b": w((1, 3 * D)),
            "ca_ow": w((D, D)), "ca_ob": w((1, D)),
            "l1w": w((d_ff, D)), "l1b": w((1, d_ff)),
            "l2w": w((D, d_ff)), "l2b": w((1, D)),
            "n1g": jnp.ones((1, D), jnp.float32), "n1b": jnp.zeros((1, D), jnp.float32),
            "n2g": jnp.ones((1, D), jnp.float32), "n2b": jnp.zeros((1, D), jnp.float32),
            "n3g": jnp.ones((1, D), jnp.float32), "n3b": jnp.zeros((1, D), jnp.float32),
        })
    return params


def pack_params(params, nhead=N_HEAD):
    """Pre-transpose / pre-fold / stack weights across layers; matmul weights in bf16;
    vocab projection padded to a 128-lane multiple for lane-dense stores."""
    D = params["embedding"].shape[1]
    V = params["fc_w"].shape[0]
    Vp = ((V + LANE - 1) // LANE) * LANE

    def stack(fn):
        return jnp.stack([fn(p) for p in params["layers"]], axis=0)

    def bf16(x):
        return x.astype(jnp.bfloat16)

    fcw = jnp.zeros((D, Vp), jnp.float32).at[:, :V].set(params["fc_w"].T)
    fcb = jnp.zeros((1, Vp), jnp.float32).at[:, :V].set(params["fc_b"])

    return {
        "embedding": params["embedding"],
        # fused QKV: (L, D, 3D) = [Wq^T | Wk^T | Wv^T] packed along output lanes
        "wqkv": bf16(stack(lambda p: p["sa_w"].T)),
        "bqkv": stack(lambda p: p["sa_b"]),                      # (L, 1, 3D) f32
        "wo": bf16(stack(lambda p: p["sa_ow"].T)),               # (L, D, D)
        "ob": stack(lambda p: p["sa_ob"]),                       # (L, 1, D)
        # zero-memory cross-attention collapses to: bv @ Wo^T + bo   (per layer)
        "ca": stack(lambda p: p["ca_b"][:, 2 * D:3 * D] @ p["ca_ow"].T + p["ca_ob"]),
        "w1": bf16(stack(lambda p: p["l1w"].T)),                 # (L, D, d_ff)
        "b1": stack(lambda p: p["l1b"]),
        "w2": bf16(stack(lambda p: p["l2w"].T)),                 # (L, d_ff, D)
        "b2": stack(lambda p: p["l2b"]),
        "n1g": stack(lambda p: p["n1g"]), "n1b": stack(lambda p: p["n1b"]),
        "n2g": stack(lambda p: p["n2g"]), "n2b": stack(lambda p: p["n2b"]),
        "n3g": stack(lambda p: p["n3g"]), "n3b": stack(lambda p: p["n3b"]),
        "fcw": bf16(fcw),                                        # (D, V_pad)
        "fcb": fcb,                                              # (1, V_pad)
    }


def vanilla_transformer_forward(tokens, packed, *, nhead=N_HEAD, num_layers=N_LAYERS):
    """tokens: (S, B) int32 (PyTorch batch_first=False). Returns logits (S, B, vocab)."""
    S, B = tokens.shape
    V = packed["embedding"].shape[0]
    D = packed["embedding"].shape[1]
    Vp = packed["fcb"].shape[-1]

    emb = jnp.take(packed["embedding"], tokens, axis=0)          # (S, B, D) gather in XLA
    x = jnp.transpose(emb, (1, 0, 2)).astype(jnp.float32)        # (B, S, D)

    def full3(a):
        return pl.BlockSpec(a.shape, lambda b: (0, 0, 0))        # resident across grid

    def full2(a):
        return pl.BlockSpec(a.shape, lambda b: (0, 0))

    weight_keys = ["wqkv", "bqkv", "wo", "ob", "ca", "w1", "b1", "w2", "b2",
                   "n1g", "n1b", "n2g", "n2b", "n3g", "n3b", "fcw", "fcb"]

    # Explicit VMEM budget: resident stacked weights + double-buffered x/out tiles
    # + per-head (S,S) scores, with headroom; clamped for v5e(16MiB default)/v7x(64MiB).
    weight_bytes = sum(int(packed[k].size) * packed[k].dtype.itemsize for k in weight_keys)
    est = (weight_bytes
           + 2 * 2 * S * D * 4          # double-buffered input tiles
           + 2 * S * Vp * 4             # double-buffered output tiles
           + 4 * S * S * 4              # scores / probs live values
           + (8 << 20))                 # headroom
    vmem_limit = int(min(max(est, 16 << 20), 48 << 20))

    kernel = functools.partial(fused_decoder_kernel, nhead=nhead, num_layers=num_layers)

    grid_spec = pltpu.PrefetchScalarGridSpec(
        num_scalar_prefetch=0,
        grid=(B,),
        in_specs=[
            pl.BlockSpec((None, S, D), lambda b: (b, 0, 0)),     # x: one batch per step
            full3(packed["wqkv"]), full3(packed["bqkv"]),
            full3(packed["wo"]), full3(packed["ob"]), full3(packed["ca"]),
            full3(packed["w1"]), full3(packed["b1"]),
            full3(packed["w2"]), full3(packed["b2"]),
            full3(packed["n1g"]), full3(packed["n1b"]),
            full3(packed["n2g"]), full3(packed["n2b"]),
            full3(packed["n3g"]), full3(packed["n3b"]),
            full2(packed["fcw"]), full2(packed["fcb"]),
        ],
        out_specs=pl.BlockSpec((None, S, Vp), lambda b: (b, 0, 0)),
    )

    logits_pad = pl.pallas_call(
        kernel,
        out_shape=jax.ShapeDtypeStruct((B, S, Vp), jnp.float32),
        grid_spec=grid_spec,
        compiler_params=pltpu.CompilerParams(
            dimension_semantics=("parallel",),
            vmem_limit_bytes=vmem_limit),
    )(x, *[packed[k] for k in weight_keys])

    logits = logits_pad[:, :, :V]                                # drop lane padding
    return jnp.transpose(logits, (1, 0, 2))                      # (S, B, V)


if __name__ == "__main__":
    vocab_size = 32
    d_model = 32
    S, B = 8, 2

    key = jax.random.PRNGKey(0)
    pkey, tkey = jax.random.split(key)
    params = init_params(pkey, vocab_size, d_model)
    packed = pack_params(params)
    tokens = jax.random.randint(tkey, (S, B), 0, vocab_size, dtype=jnp.int32)

    fwd = jax.jit(vanilla_transformer_forward)
    out = jax.block_until_ready(fwd(tokens, packed))

    assert out.shape == (S, B, vocab_size), out.shape
    assert bool(jnp.all(jnp.isfinite(out)))
    print("KERNEL_OK")
</pallas_src>

<mosaic_0001>
module attributes {stable_mosaic.version = 11 : i64} {
  func.func @fused_decoder_kernel(%arg0: i32, %arg1: memref<1x8x32xf32, #tpu.memory_space<vmem>>, %arg2: memref<6x32x96xbf16, #tpu.memory_space<vmem>>, %arg3: memref<6x1x96xf32, #tpu.memory_space<vmem>>, %arg4: memref<6x32x32xbf16, #tpu.memory_space<vmem>>, %arg5: memref<6x1x32xf32, #tpu.memory_space<vmem>>, %arg6: memref<6x1x32xf32, #tpu.memory_space<vmem>>, %arg7: memref<6x32x512xbf16, #tpu.memory_space<vmem>>, %arg8: memref<6x1x512xf32, #tpu.memory_space<vmem>>, %arg9: memref<6x512x32xbf16, #tpu.memory_space<vmem>>, %arg10: memref<6x1x32xf32, #tpu.memory_space<vmem>>, %arg11: memref<6x1x32xf32, #tpu.memory_space<vmem>>, %arg12: memref<6x1x32xf32, #tpu.memory_space<vmem>>, %arg13: memref<6x1x32xf32, #tpu.memory_space<vmem>>, %arg14: memref<6x1x32xf32, #tpu.memory_space<vmem>>, %arg15: memref<6x1x32xf32, #tpu.memory_space<vmem>>, %arg16: memref<6x1x32xf32, #tpu.memory_space<vmem>>, %arg17: memref<32x128xbf16, #tpu.memory_space<vmem>>, %arg18: memref<1x128xf32, #tpu.memory_space<vmem>>, %arg19: memref<1x8x128xf32, #tpu.memory_space<vmem>>) attributes {dimension_semantics = [#tpu.dimension_semantics<parallel>], iteration_bounds = array<i64: 2>, scalar_prefetch = 0 : i64, scratch_operands = 0 : i64, tpu.core_type = #tpu.core_type<tc>, window_params = [{transform_indices = @transform_0, window_bounds = array<i64: 1, 8, 32>}, {pipeline_mode = #tpu.pipeline_mode<synchronous>, transform_indices = @transform_1, window_bounds = array<i64: 6, 32, 96>}, {pipeline_mode = #tpu.pipeline_mode<synchronous>, transform_indices = @transform_2, window_bounds = array<i64: 6, 1, 96>}, {pipeline_mode = #tpu.pipeline_mode<synchronous>, transform_indices = @transform_3, window_bounds = array<i64: 6, 32, 32>}, {pipeline_mode = #tpu.pipeline_mode<synchronous>, transform_indices = @transform_4, window_bounds = array<i64: 6, 1, 32>}, {pipeline_mode = #tpu.pipeline_mode<synchronous>, transform_indices = @transform_5, window_bounds = array<i64: 6, 1, 32>}, {pipeline_mode = #tpu.pipeline_mode<synchronous>, transform_indices = @transform_6, window_bounds = array<i64: 6, 32, 512>}, {pipeline_mode = #tpu.pipeline_mode<synchronous>, transform_indices = @transform_7, window_bounds = array<i64: 6, 1, 512>}, {pipeline_mode = #tpu.pipeline_mode<synchronous>, transform_indices = @transform_8, window_bounds = array<i64: 6, 512, 32>}, {pipeline_mode = #tpu.pipeline_mode<synchronous>, transform_indices = @transform_9, window_bounds = array<i64: 6, 1, 32>}, {pipeline_mode = #tpu.pipeline_mode<synchronous>, transform_indices = @transform_10, window_bounds = array<i64: 6, 1, 32>}, {pipeline_mode = #tpu.pipeline_mode<synchronous>, transform_indices = @transform_11, window_bounds = array<i64: 6, 1, 32>}, {pipeline_mode = #tpu.pipeline_mode<synchronous>, transform_indices = @transform_12, window_bounds = array<i64: 6, 1, 32>}, {pipeline_mode = #tpu.pipeline_mode<synchronous>, transform_indices = @transform_13, window_bounds = array<i64: 6, 1, 32>}, {pipeline_mode = #tpu.pipeline_mode<synchronous>, transform_indices = @transform_14, window_bounds = array<i64: 6, 1, 32>}, {pipeline_mode = #tpu.pipeline_mode<synchronous>, transform_indices = @transform_15, window_bounds = array<i64: 6, 1, 32>}, {pipeline_mode = #tpu.pipeline_mode<synchronous>, transform_indices = @transform_16, window_bounds = array<i64: 32, 128>}, {pipeline_mode = #tpu.pipeline_mode<synchronous>, transform_indices = @transform_17, window_bounds = array<i64: 1, 128>}, {transform_indices = @transform_18, window_bounds = array<i64: 1, 8, 128>}]} {
    %c0 = arith.constant 0 : index
    %c0_0 = arith.constant 0 : index
    %c0_1 = arith.constant 0 : index
    %0 = vector.load %arg1[%c0, %c0_0, %c0_1] : memref<1x8x32xf32, #tpu.memory_space<vmem>>, vector<1x8x32xf32>
    %1 = vector.shape_cast %0 : vector<1x8x32xf32> to vector<8x32xf32>
    %2 = tpu.iota {dimensions = array<i32: 0>} : vector<8x1xi32>
    %3 = tpu.iota {dimensions = array<i32: 1>} : vector<1x8xi32>
    %4 = vector.broadcast %3 : vector<1x8xi32> to vector<8x8xi32>
    %5 = vector.broadcast %2 : vector<8x1xi32> to vector<8x8xi32>
    %6 = arith.cmpi sle, %4, %5 : vector<8x8xi32>
    %cst = arith.constant 0.353553385 : f32
    %c0_i32 = arith.constant 0 : i32
    %c6_i32 = arith.constant 6 : i32
    %7 = arith.addi %c0_i32, %c6_i32 : i32
    %c1_i32 = arith.constant 1 : i32
    %8 = scf.for %arg20 = %c0_i32 to %7 step %c1_i32 iter_args(%arg21 = %1) -> (vector<8x32xf32>)  : i32 {
      %18 = arith.truncf %arg21 : vector<8x32xf32> to vector<8x32xbf16>
      %19 = arith.index_cast %arg20 : i32 to index
      %c0_11 = arith.constant 0 : index
      %c0_12 = arith.constant 0 : index
      %20 = vector.load %arg2[%19, %c0_11, %c0_12] : memref<6x32x96xbf16, #tpu.memory_space<vmem>>, vector<1x32x96xbf16>
      %21 = vector.shape_cast %20 : vector<1x32x96xbf16> to vector<32x96xbf16>
      %cst_13 = arith.constant dense<0.000000e+00> : vector<8x96xf32>
      %22 = tpu.matmul %18, %21, %cst_13 {dimension_numbers = #tpu.dot_dimension_numbers<[1], [0], [0], [1], [0, 0, 1, 1], [], []>} : vector<8x32xbf16>, vector<32x96xbf16>, vector<8x96xf32> -> vector<8x96xf32>
      %23 = arith.index_cast %arg20 : i32 to index
      %c0_14 = arith.constant 0 : index
      %c0_15 = arith.constant 0 : index
      %24 = vector.load %arg3[%23, %c0_14, %c0_15] : memref<6x1x96xf32, #tpu.memory_space<vmem>>, vector<1x1x96xf32>
      %25 = vector.shape_cast %24 : vector<1x1x96xf32> to vector<1x96xf32>
      %26 = vector.broadcast %25 : vector<1x96xf32> to vector<8x96xf32>
      %27 = arith.addf %22, %26 : vector<8x96xf32>
      %28 = vector.extract_strided_slice %27 {offsets = [0, 0], sizes = [8, 8], strides = [1, 1]} : vector<8x96xf32> to vector<8x8xf32>
      %29 = vector.extract_strided_slice %27 {offsets = [0, 32], sizes = [8, 8], strides = [1, 1]} : vector<8x96xf32> to vector<8x8xf32>
      %30 = vector.extract_strided_slice %27 {offsets = [0, 64], sizes = [8, 8], strides = [1, 1]} : vector<8x96xf32> to vector<8x8xf32>
      %31 = arith.truncf %28 : vector<8x8xf32> to vector<8x8xbf16>
      %32 = arith.truncf %29 : vector<8x8xf32> to vector<8x8xbf16>
      %cst_16 = arith.constant dense<0.000000e+00> : vector<8x8xf32>
      %33 = tpu.matmul %31, %32, %cst_16 {dimension_numbers = #tpu.dot_dimension_numbers<[1], [1], [0], [0], [0, 0, 1, 0], [], []>} : vector<8x8xbf16>, vector<8x8xbf16>, vector<8x8xf32> -> vector<8x8xf32>
      %34 = vector.broadcast %cst : f32 to vector<8x8xf32>
      %35 = arith.mulf %33, %34 : vector<8x8xf32>
      %cst_17 = arith.constant -1.000000e+30 : f32
      %36 = vector.broadcast %cst_17 : f32 to vector<8x8xf32>
      %37 = arith.select %6, %35, %36 : vector<8x8xi1>, vector<8x8xf32>
      %cst_18 = arith.constant dense<0xFF800000> : vector<8xf32>
      %38 = vector.multi_reduction <maximumf>, %37, %cst_18 [1] : vector<8x8xf32> to vector<8xf32>
      %39 = vector.shape_cast %38 : vector<8xf32> to vector<8x1xf32>
      %40 = vector.broadcast %39 : vector<8x1xf32> to vector<8x8xf32>
      %41 = arith.subf %37, %40 : vector<8x8xf32>
      %42 = math.exp %41 : vector<8x8xf32>
      %cst_19 = arith.constant dense<0.000000e+00> : vector<8xf32>
      %43 = vector.multi_reduction <add>, %42, %cst_19 [1] : vector<8x8xf32> to vector<8xf32>
      %44 = vector.shape_cast %43 : vector<8xf32> to vector<8x1xf32>
      %45 = tpu.reciprocal %44 {approx = true} : vector<8x1xf32> -> vector<8x1xf32>
      %46 = vector.broadcast %45 : vector<8x1xf32> to vector<8x8xf32>
      %47 = arith.mulf %42, %46 : vector<8x8xf32>
      %48 = arith.truncf %47 : vector<8x8xf32> to vector<8x8xbf16>
      %49 = arith.truncf %30 : vector<8x8xf32> to vector<8x8xbf16>
      %cst_20 = arith.constant dense<0.000000e+00> : vector<8x8xf32>
      %50 = tpu.matmul %48, %49, %cst_20 {dimension_numbers = #tpu.dot_dimension_numbers<[1], [0], [0], [1], [0, 0, 1, 1], [], []>} : vector<8x8xbf16>, vector<8x8xbf16>, vector<8x8xf32> -> vector<8x8xf32>
      %51 = vector.extract_strided_slice %27 {offsets = [0, 8], sizes = [8, 8], strides = [1, 1]} : vector<8x96xf32> to vector<8x8xf32>
      %52 = vector.extract_strided_slice %27 {offsets = [0, 40], sizes = [8, 8], strides = [1, 1]} : vector<8x96xf32> to vector<8x8xf32>
      %53 = vector.extract_strided_slice %27 {offsets = [0, 72], sizes = [8, 8], strides = [1, 1]} : vector<8x96xf32> to vector<8x8xf32>
      %54 = arith.truncf %51 : vector<8x8xf32> to vector<8x8xbf16>
      %55 = arith.truncf %52 : vector<8x8xf32> to vector<8x8xbf16>
      %cst_21 = arith.constant dense<0.000000e+00> : vector<8x8xf32>
      %56 = tpu.matmul %54, %55, %cst_21 {dimension_numbers = #tpu.dot_dimension_numbers<[1], [1], [0], [0], [0, 0, 1, 0], [], []>} : vector<8x8xbf16>, vector<8x8xbf16>, vector<8x8xf32> -> vector<8x8xf32>
      %57 = vector.broadcast %cst : f32 to vector<8x8xf32>
      %58 = arith.mulf %56, %57 : vector<8x8xf32>
      %cst_22 = arith.constant -1.000000e+30 : f32
      %59 = vector.broadcast %cst_22 : f32 to vector<8x8xf32>
      %60 = arith.select %6, %58, %59 : vector<8x8xi1>, vector<8x8xf32>
      %cst_23 = arith.constant dense<0xFF800000> : vector<8xf32>
      %61 = vector.multi_reduction <maximumf>, %60, %cst_23 [1] : vector<8x8xf32> to vector<8xf32>
      %62 = vector.shape_cast %61 : vector<8xf32> to vector<8x1xf32>
      %63 = vector.broadcast %62 : vector<8x1xf32> to vector<8x8xf32>
      %64 = arith.subf %60, %63 : vector<8x8xf32>
      %65 = math.exp %64 : vector<8x8xf32>
      %cst_24 = arith.constant dense<0.000000e+00> : vector<8xf32>
      %66 = vector.multi_reduction <add>, %65, %cst_24 [1] : vector<8x8xf32> to vector<8xf32>
      %67 = vector.shape_cast %66 : vector<8xf32> to vector<8x1xf32>
      %68 = tpu.reciprocal %67 {approx = true} : vector<8x1xf32> -> vector<8x1xf32>
      %69 = vector.broadcast %68 : vector<8x1xf32> to vector<8x8xf32>
      %70 = arith.mulf %65, %69 : vector<8x8xf32>
      %71 = arith.truncf %70 : vector<8x8xf32> to vector<8x8xbf16>
      %72 = arith.truncf %53 : vector<8x8xf32> to vector<8x8xbf16>
      %cst_25 = arith.constant dense<0.000000e+00> : vector<8x8xf32>
      %73 = tpu.matmul %71, %72, %cst_25 {dimension_numbers = #tpu.dot_dimension_numbers<[1], [0], [0], [1], [0, 0, 1, 1], [], []>} : vector<8x8xbf16>, vector<8x8xbf16>, vector<8x8xf32> -> vector<8x8xf32>
      %74 = vector.extract_strided_slice %27 {offsets = [0, 16], sizes = [8, 8], strides = [1, 1]} : vector<8x96xf32> to vector<8x8xf32>
      %75 = vector.extract_strided_slice %27 {offsets = [0, 48], sizes = [8, 8], strides = [1, 1]} : vector<8x96xf32> to vector<8x8xf32>
      %76 = vector.extract_strided_slice %27 {offsets = [0, 80], sizes = [8, 8], strides = [1, 1]} : vector<8x96xf32> to vector<8x8xf32>
      %77 = arith.truncf %74 : vector<8x8xf32> to vector<8x8xbf16>
      %78 = arith.truncf %75 : vector<8x8xf32> to vector<8x8xbf16>
      %cst_26 = arith.constant dense<0.000000e+00> : vector<8x8xf32>
      %79 = tpu.matmul %77, %78, %cst_26 {dimension_numbers = #tpu.dot_dimension_numbers<[1], [1], [0], [0], [0, 0, 1, 0], [], []>} : vector<8x8xbf16>, vector<8x8xbf16>, vector<8x8xf32> -> vector<8x8xf32>
      %80 = vector.broadcast %cst : f32 to vector<8x8xf32>
      %81 = arith.mulf %79, %80 : vector<8x8xf32>
      %cst_27 = arith.constant -1.000000e+30 : f32
      %82 = vector.broadcast %cst_27 : f32 to vector<8x8xf32>
      %83 = arith.select %6, %81, %82 : vector<8x8xi1>, vector<8x8xf32>
      %cst_28 = arith.constant dense<0xFF800000> : vector<8xf32>
      %84 = vector.multi_reduction <maximumf>, %83, %cst_28 [1] : vector<8x8xf32> to vector<8xf32>
      %85 = vector.shape_cast %84 : vector<8xf32> to vector<8x1xf32>
      %86 = vector.broadcast %85 : vector<8x1xf32> to vector<8x8xf32>
      %87 = arith.subf %83, %86 : vector<8x8xf32>
      %88 = math.exp %87 : vector<8x8xf32>
      %cst_29 = arith.constant dense<0.000000e+00> : vector<8xf32>
      %89 = vector.multi_reduction <add>, %88, %cst_29 [1] : vector<8x8xf32> to vector<8xf32>
      %90 = vector.shape_cast %89 : vector<8xf32> to vector<8x1xf32>
      %91 = tpu.reciprocal %90 {approx = true} : vector<8x1xf32> -> vector<8x1xf32>
      %92 = vector.broadcast %91 : vector<8x1xf32> to vector<8x8xf32>
      %93 = arith.mulf %88, %92 : vector<8x8xf32>
      %94 = arith.truncf %93 : vector<8x8xf32> to vector<8x8xbf16>
      %95 = arith.truncf %76 : vector<8x8xf32> to vector<8x8xbf16>
      %cst_30 = arith.constant dense<0.000000e+00> : vector<8x8xf32>
      %96 = tpu.matmul %94, %95, %cst_30 {dimension_numbers = #tpu.dot_dimension_numbers<[1], [0], [0], [1], [0, 0, 1, 1], [], []>} : vector<8x8xbf16>, vector<8x8xbf16>, vector<8x8xf32> -> vector<8x8xf32>
      %97 = vector.extract_strided_slice %27 {offsets = [0, 24], sizes = [8, 8], strides = [1, 1]} : vector<8x96xf32> to vector<8x8xf32>
      %98 = vector.extract_strided_slice %27 {offsets = [0, 56], sizes = [8, 8], strides = [1, 1]} : vector<8x96xf32> to vector<8x8xf32>
      %99 = vector.extract_strided_slice %27 {offsets = [0, 88], sizes = [8, 8], strides = [1, 1]} : vector<8x96xf32> to vector<8x8xf32>
      %100 = arith.truncf %97 : vector<8x8xf32> to vector<8x8xbf16>
      %101 = arith.truncf %98 : vector<8x8xf32> to vector<8x8xbf16>
      %cst_31 = arith.constant dense<0.000000e+00> : vector<8x8xf32>
      %102 = tpu.matmul %100, %101, %cst_31 {dimension_numbers = #tpu.dot_dimension_numbers<[1], [1], [0], [0], [0, 0, 1, 0], [], []>} : vector<8x8xbf16>, vector<8x8xbf16>, vector<8x8xf32> -> vector<8x8xf32>
      %103 = vector.broadcast %cst : f32 to vector<8x8xf32>
      %104 = arith.mulf %102, %103 : vector<8x8xf32>
      %cst_32 = arith.constant -1.000000e+30 : f32
      %105 = vector.broadcast %cst_32 : f32 to vector<8x8xf32>
      %106 = arith.select %6, %104, %105 : vector<8x8xi1>, vector<8x8xf32>
      %cst_33 = arith.constant dense<0xFF800000> : vector<8xf32>
      %107 = vector.multi_reduction <maximumf>, %106, %cst_33 [1] : vector<8x8xf32> to vector<8xf32>
      %108 = vector.shape_cast %107 : vector<8xf32> to vector<8x1xf32>
      %109 = vector.broadcast %108 : vector<8x1xf32> to vector<8x8xf32>
      %110 = arith.subf %106, %109 : vector<8x8xf32>
      %111 = math.exp %110 : vector<8x8xf32>
      %cst_34 = arith.constant dense<0.000000e+00> : vector<8xf32>
      %112 = vector.multi_reduction <add>, %111, %cst_34 [1] : vector<8x8xf32> to vector<8xf32>
      %113 = vector.shape_cast %112 : vector<8xf32> to vector<8x1xf32>
      %114 = tpu.reciprocal %113 {approx = true} : vector<8x1xf32> -> vector<8x1xf32>
      %115 = vector.broadcast %114 : vector<8x1xf32> to vector<8x8xf32>
      %116 = arith.mulf %111, %115 : vector<8x8xf32>
      %117 = arith.truncf %116 : vector<8x8xf32> to vector<8x8xbf16>
      %118 = arith.truncf %99 : vector<8x8xf32> to vector<8x8xbf16>
      %cst_35 = arith.constant dense<0.000000e+00> : vector<8x8xf32>
      %119 = tpu.matmul %117, %118, %cst_35 {dimension_numbers = #tpu.dot_dimension_numbers<[1], [0], [0], [1], [0, 0, 1, 1], [], []>} : vector<8x8xbf16>, vector<8x8xbf16>, vector<8x8xf32> -> vector<8x8xf32>
      %120 = tpu.concatenate %50, %73, %96, %119 in 1 : vector<8x8xf32>, vector<8x8xf32>, vector<8x8xf32>, vector<8x8xf32> -> vector<8x32xf32>
      %121 = arith.truncf %120 : vector<8x32xf32> to vector<8x32xbf16>
      %122 = arith.index_cast %arg20 : i32 to index
      %c0_36 = arith.constant 0 : index
      %c0_37 = arith.constant 0 : index
      %123 = vector.load %arg4[%122, %c0_36, %c0_37] : memref<6x32x32xbf16, #tpu.memory_space<vmem>>, vector<1x32x32xbf16>
      %124 = vector.shape_cast %123 : vector<1x32x32xbf16> to vector<32x32xbf16>
      %cst_38 = arith.constant dense<0.000000e+00> : vector<8x32xf32>
      %125 = tpu.matmul %121, %124, %cst_38 {dimension_numbers = #tpu.dot_dimension_numbers<[1], [0], [0], [1], [0, 0, 1, 1], [], []>} : vector<8x32xbf16>, vector<32x32xbf16>, vector<8x32xf32> -> vector<8x32xf32>
      %126 = arith.index_cast %arg20 : i32 to index
      %c0_39 = arith.constant 0 : index
      %c0_40 = arith.constant 0 : index
      %127 = vector.load %arg5[%126, %c0_39, %c0_40] : memref<6x1x32xf32, #tpu.memory_space<vmem>>, vector<1x1x32xf32>
      %128 = vector.shape_cast %127 : vector<1x1x32xf32> to vector<1x32xf32>
      %129 = vector.broadcast %128 : vector<1x32xf32> to vector<8x32xf32>
      %130 = arith.addf %125, %129 : vector<8x32xf32>
      %131 = arith.addf %arg21, %130 : vector<8x32xf32>
      %132 = arith.index_cast %arg20 : i32 to index
      %c0_41 = arith.constant 0 : index
      %c0_42 = arith.constant 0 : index
      %133 = vector.load %arg11[%132, %c0_41, %c0_42] : memref<6x1x32xf32, #tpu.memory_space<vmem>>, vector<1x1x32xf32>
      %134 = vector.shape_cast %133 : vector<1x1x32xf32> to vector<1x32xf32>
      %135 = arith.index_cast %arg20 : i32 to index
      %c0_43 = arith.constant 0 : index
      %c0_44 = arith.constant 0 : index
      %136 = vector.load %arg12[%135, %c0_43, %c0_44] : memref<6x1x32xf32, #tpu.memory_space<vmem>>, vector<1x1x32xf32>
      %137 = vector.shape_cast %136 : vector<1x1x32xf32> to vector<1x32xf32>
      %cst_45 = arith.constant dense<0.000000e+00> : vector<8xf32>
      %138 = vector.multi_reduction <add>, %131, %cst_45 [1] : vector<8x32xf32> to vector<8xf32>
      %139 = vector.shape_cast %138 : vector<8xf32> to vector<8x1xf32>
      %cst_46 = arith.constant 3.200000e+01 : f32
      %140 = vector.broadcast %cst_46 : f32 to vector<8x1xf32>
      %141 = arith.divf %139, %140 : vector<8x1xf32>
      %142 = vector.broadcast %141 : vector<8x1xf32> to vector<8x32xf32>
      %143 = arith.subf %131, %142 : vector<8x32xf32>
      %144 = arith.mulf %143, %143 : vector<8x32xf32>
      %cst_47 = arith.constant dense<0.000000e+00> : vector<8xf32>
      %145 = vector.multi_reduction <add>, %144, %cst_47 [1] : vector<8x32xf32> to vector<8xf32>
      %146 = vector.shape_cast %145 : vector<8xf32> to vector<8x1xf32>
      %cst_48 = arith.constant 3.200000e+01 : f32
      %147 = vector.broadcast %cst_48 : f32 to vector<8x1xf32>
      %148 = arith.divf %146, %147 : vector<8x1xf32>
      %149 = vector.broadcast %141 : vector<8x1xf32> to vector<8x32xf32>
      %150 = arith.subf %131, %149 : vector<8x32xf32>
      %cst_49 = arith.constant 9.99999974E-6 : f32
      %151 = vector.broadcast %cst_49 : f32 to vector<8x1xf32>
      %152 = arith.addf %148, %151 : vector<8x1xf32>
      %153 = math.rsqrt %152 : vector<8x1xf32>
      %154 = vector.broadcast %153 : vector<8x1xf32> to vector<8x32xf32>
      %155 = arith.mulf %150, %154 : vector<8x32xf32>
      %156 = vector.broadcast %134 : vector<1x32xf32> to vector<8x32xf32>
      %157 = arith.mulf %155, %156 : vector<8x32xf32>
      %158 = vector.broadcast %137 : vector<1x32xf32> to vector<8x32xf32>
      %159 = arith.addf %157, %158 : vector<8x32xf32>
      %160 = arith.index_cast %arg20 : i32 to index
      %c0_50 = arith.constant 0 : index
      %c0_51 = arith.constant 0 : index
      %161 = vector.load %arg6[%160, %c0_50, %c0_51] : memref<6x1x32xf32, #tpu.memory_space<vmem>>, vector<1x1x32xf32>
      %162 = vector.shape_cast %161 : vector<1x1x32xf32> to vector<1x32xf32>
      %163 = vector.broadcast %162 : vector<1x32xf32> to vector<8x32xf32>
      %164 = arith.addf %159, %163 : vector<8x32xf32>
      %165 = arith.index_cast %arg20 : i32 to index
      %c0_52 = arith.constant 0 : index
      %c0_53 = arith.constant 0 : index
      %166 = vector.load %arg13[%165, %c0_52, %c0_53] : memref<6x1x32xf32, #tpu.memory_space<vmem>>, vector<1x1x32xf32>
      %167 = vector.shape_cast %166 : vector<1x1x32xf32> to vector<1x32xf32>
      %168 = arith.index_cast %arg20 : i32 to index
      %c0_54 = arith.constant 0 : index
      %c0_55 = arith.constant 0 : index
      %169 = vector.load %arg14[%168, %c0_54, %c0_55] : memref<6x1x32xf32, #tpu.memory_space<vmem>>, vector<1x1x32xf32>
      %170 = vector.shape_cast %169 : vector<1x1x32xf32> to vector<1x32xf32>
      %cst_56 = arith.constant dense<0.000000e+00> : vector<8xf32>
      %171 = vector.multi_reduction <add>, %164, %cst_56 [1] : vector<8x32xf32> to vector<8xf32>
      %172 = vector.shape_cast %171 : vector<8xf32> to vector<8x1xf32>
      %cst_57 = arith.constant 3.200000e+01 : f32
      %173 = vector.broadcast %cst_57 : f32 to vector<8x1xf32>
      %174 = arith.divf %172, %173 : vector<8x1xf32>
      %175 = vector.broadcast %174 : vector<8x1xf32> to vector<8x32xf32>
      %176 = arith.subf %164, %175 : vector<8x32xf32>
      %177 = arith.mulf %176, %176 : vector<8x32xf32>
      %cst_58 = arith.constant dense<0.000000e+00> : vector<8xf32>
      %178 = vector.multi_reduction <add>, %177, %cst_58 [1] : vector<8x32xf32> to vector<8xf32>
      %179 = vector.shape_cast %178 : vector<8xf32> to vector<8x1xf32>
      %cst_59 = arith.constant 3.200000e+01 : f32
      %180 = vector.broadcast %cst_59 : f32 to vector<8x1xf32>
      %181 = arith.divf %179, %180 : vector<8x1xf32>
      %182 = vector.broadcast %174 : vector<8x1xf32> to vector<8x32xf32>
      %183 = arith.subf %164, %182 : vector<8x32xf32>
      %cst_60 = arith.constant 9.99999974E-6 : f32
      %184 = vector.broadcast %cst_60 : f32 to vector<8x1xf32>
      %185 = arith.addf %181, %184 : vector<8x1xf32>
      %186 = math.rsqrt %185 : vector<8x1xf32>
      %187 = vector.broadcast %186 : vector<8x1xf32> to vector<8x32xf32>
      %188 = arith.mulf %183, %187 : vector<8x32xf32>
      %189 = vector.broadcast %167 : vector<1x32xf32> to vector<8x32xf32>
      %190 = arith.mulf %188, %189 : vector<8x32xf32>
      %191 = vector.broadcast %170 : vector<1x32xf32> to vector<8x32xf32>
      %192 = arith.addf %190, %191 : vector<8x32xf32>
      %193 = arith.truncf %192 : vector<8x32xf32> to vector<8x32xbf16>
      %194 = arith.index_cast %arg20 : i32 to index
      %c0_61 = arith.constant 0 : index
      %c0_62 = arith.constant 0 : index
      %195 = vector.load %arg7[%194, %c0_61, %c0_62] : memref<6x32x512xbf16, #tpu.memory_space<vmem>>, vector<1x32x512xbf16>
      %196 = vector.shape_cast %195 : vector<1x32x512xbf16> to vector<32x512xbf16>
      %cst_63 = arith.constant dense<0.000000e+00> : vector<8x512xf32>
      %197 = tpu.matmul %193, %196, %cst_63 {dimension_numbers = #tpu.dot_dimension_numbers<[1], [0], [0], [1], [0, 0, 1, 1], [], []>} : vector<8x32xbf16>, vector<32x512xbf16>, vector<8x512xf32> -> vector<8x512xf32>
      %198 = arith.index_cast %arg20 : i32 to index
      %c0_64 = arith.constant 0 : index
      %c0_65 = arith.constant 0 : index
      %199 = vector.load %arg8[%198, %c0_64, %c0_65] : memref<6x1x512xf32, #tpu.memory_space<vmem>>, vector<1x1x512xf32>
      %200 = vector.shape_cast %199 : vector<1x1x512xf32> to vector<1x512xf32>
      %201 = vector.broadcast %200 : vector<1x512xf32> to vector<8x512xf32>
      %202 = arith.addf %197, %201 : vector<8x512xf32>
      %cst_66 = arith.constant 0.000000e+00 : f32
      %203 = vector.broadcast %cst_66 : f32 to vector<8x512xf32>
      %204 = arith.maximumf %202, %203 : vector<8x512xf32>
      %205 = arith.truncf %204 : vector<8x512xf32> to vector<8x512xbf16>
      %206 = arith.index_cast %arg20 : i32 to index
      %c0_67 = arith.constant 0 : index
      %c0_68 = arith.constant 0 : index
      %207 = vector.load %arg9[%206, %c0_67, %c0_68] : memref<6x512x32xbf16, #tpu.memory_space<vmem>>, vector<1x512x32xbf16>
      %208 = vector.shape_cast %207 : vector<1x512x32xbf16> to vector<512x32xbf16>
      %cst_69 = arith.constant dense<0.000000e+00> : vector<8x32xf32>
      %209 = tpu.matmul %205, %208, %cst_69 {dimension_numbers = #tpu.dot_dimension_numbers<[1], [0], [0], [1], [0, 0, 1, 1], [], []>} : vector<8x512xbf16>, vector<512x32xbf16>, vector<8x32xf32> -> vector<8x32xf32>
      %210 = arith.index_cast %arg20 : i32 to index
      %c0_70 = arith.constant 0 : index
      %c0_71 = arith.constant 0 : index
      %211 = vector.load %arg10[%210, %c0_70, %c0_71] : memref<6x1x32xf32, #tpu.memory_space<vmem>>, vector<1x1x32xf32>
      %212 = vector.shape_cast %211 : vector<1x1x32xf32> to vector<1x32xf32>
      %213 = vector.broadcast %212 : vector<1x32xf32> to vector<8x32xf32>
      %214 = arith.addf %209, %213 : vector<8x32xf32>
      %215 = arith.addf %192, %214 : vector<8x32xf32>
      %216 = arith.index_cast %arg20 : i32 to index
      %c0_72 = arith.constant 0 : index
      %c0_73 = arith.constant 0 : index
      %217 = vector.load %arg15[%216, %c0_72, %c0_73] : memref<6x1x32xf32, #tpu.memory_space<vmem>>, vector<1x1x32xf32>
      %218 = vector.shape_cast %217 : vector<1x1x32xf32> to vector<1x32xf32>
      %219 = arith.index_cast %arg20 : i32 to index
      %c0_74 = arith.constant 0 : index
      %c0_75 = arith.constant 0 : index
      %220 = vector.load %arg16[%219, %c0_74, %c0_75] : memref<6x1x32xf32, #tpu.memory_space<vmem>>, vector<1x1x32xf32>
      %221 = vector.shape_cast %220 : vector<1x1x32xf32> to vector<1x32xf32>
      %cst_76 = arith.constant dense<0.000000e+00> : vector<8xf32>
      %222 = vector.multi_reduction <add>, %215, %cst_76 [1] : vector<8x32xf32> to vector<8xf32>
      %223 = vector.shape_cast %222 : vector<8xf32> to vector<8x1xf32>
      %cst_77 = arith.constant 3.200000e+01 : f32
      %224 = vector.broadcast %cst_77 : f32 to vector<8x1xf32>
      %225 = arith.divf %223, %224 : vector<8x1xf32>
      %226 = vector.broadcast %225 : vector<8x1xf32> to vector<8x32xf32>
      %227 = arith.subf %215, %226 : vector<8x32xf32>
      %228 = arith.mulf %227, %227 : vector<8x32xf32>
      %cst_78 = arith.constant dense<0.000000e+00> : vector<8xf32>
      %229 = vector.multi_reduction <add>, %228, %cst_78 [1] : vector<8x32xf32> to vector<8xf32>
      %230 = vector.shape_cast %229 : vector<8xf32> to vector<8x1xf32>
      %cst_79 = arith.constant 3.200000e+01 : f32
      %231 = vector.broadcast %cst_79 : f32 to vector<8x1xf32>
      %232 = arith.divf %230, %231 : vector<8x1xf32>
      %233 = vector.broadcast %225 : vector<8x1xf32> to vector<8x32xf32>
      %234 = arith.subf %215, %233 : vector<8x32xf32>
      %cst_80 = arith.constant 9.99999974E-6 : f32
      %235 = vector.broadcast %cst_80 : f32 to vector<8x1xf32>
      %236 = arith.addf %232, %235 : vector<8x1xf32>
      %237 = math.rsqrt %236 : vector<8x1xf32>
      %238 = vector.broadcast %237 : vector<8x1xf32> to vector<8x32xf32>
      %239 = arith.mulf %234, %238 : vector<8x32xf32>
      %240 = vector.broadcast %218 : vector<1x32xf32> to vector<8x32xf32>
      %241 = arith.mulf %239, %240 : vector<8x32xf32>
      %242 = vector.broadcast %221 : vector<1x32xf32> to vector<8x32xf32>
      %243 = arith.addf %241, %242 : vector<8x32xf32>
      scf.yield %243 : vector<8x32xf32>
    }
    %c6_i32_2 = arith.constant 6 : i32
    %9 = arith.truncf %8 : vector<8x32xf32> to vector<8x32xbf16>
    %c0_3 = arith.constant 0 : index
    %c0_4 = arith.constant 0 : index
    %10 = vector.load %arg17[%c0_3, %c0_4] : memref<32x128xbf16, #tpu.memory_space<vmem>>, vector<32x128xbf16>
    %cst_5 = arith.constant dense<0.000000e+00> : vector<8x128xf32>
    %11 = tpu.matmul %9, %10, %cst_5 {dimension_numbers = #tpu.dot_dimension_numbers<[1], [0], [0], [1], [0, 0, 1, 1], [], []>} : vector<8x32xbf16>, vector<32x128xbf16>, vector<8x128xf32> -> vector<8x128xf32>
    %c0_6 = arith.constant 0 : index
    %c0_7 = arith.constant 0 : index
    %12 = vector.load %arg18[%c0_6, %c0_7] : memref<1x128xf32, #tpu.memory_space<vmem>>, vector<1x128xf32>
    %13 = vector.broadcast %12 : vector<1x128xf32> to vector<8x128xf32>
    %14 = arith.addf %11, %13 : vector<8x128xf32>
    %c0_8 = arith.constant 0 : index
    %c0_9 = arith.constant 0 : index
    %c0_10 = arith.constant 0 : index
    %15 = vector.load %arg19[%c0_8, %c0_9, %c0_10] : memref<1x8x128xf32, #tpu.memory_space<vmem>>, vector<1x8x128xf32>
    %16 = vector.shape_cast %15 : vector<1x8x128xf32> to vector<8x128xf32>
    %17 = vector.shape_cast %14 : vector<8x128xf32> to vector<1x8x128xf32>
    tpu.vector_store %arg19[%c0_8, %c0_9, %c0_10], %17 {strides = array<i32>} : memref<1x8x128xf32, #tpu.memory_space<vmem>>, vector<1x8x128xf32>,
    return
  }
  func.func @transform_0(%arg0: i32) -> (i32, i32, i32) {
    %c0_i32 = arith.constant 0 : i32
    %c0_i32_0 = arith.constant 0 : i32
    %c0_i32_1 = arith.constant 0 : i32
    return %arg0, %c0_i32, %c0_i32_0 : i32, i32, i32
  }
  func.func @transform_1(%arg0: i32) -> (i32, i32, i32) {
    %c0_i32 = arith.constant 0 : i32
    %c0_i32_0 = arith.constant 0 : i32
    %c0_i32_1 = arith.constant 0 : i32
    %c0_i32_2 = arith.constant 0 : i32
    return %c0_i32, %c0_i32_0, %c0_i32_1 : i32, i32, i32
  }
  func.func @transform_2(%arg0: i32) -> (i32, i32, i32) {
    %c0_i32 = arith.constant 0 : i32
    %c0_i32_0 = arith.constant 0 : i32
    %c0_i32_1 = arith.constant 0 : i32
    %c0_i32_2 = arith.constant 0 : i32
    return %c0_i32, %c0_i32_0, %c0_i32_1 : i32, i32, i32
  }
  func.func @transform_3(%arg0: i32) -> (i32, i32, i32) {
    %c0_i32 = arith.constant 0 : i32
    %c0_i32_0 = arith.constant 0 : i32
    %c0_i32_1 = arith.constant 0 : i32
    %c0_i32_2 = arith.constant 0 : i32
    return %c0_i32, %c0_i32_0, %c0_i32_1 : i32, i32, i32
  }
  func.func @transform_4(%arg0: i32) -> (i32, i32, i32) {
    %c0_i32 = arith.constant 0 : i32
    %c0_i32_0 = arith.constant 0 : i32
    %c0_i32_1 = arith.constant 0 : i32
    %c0_i32_2 = arith.constant 0 : i32
    return %c0_i32, %c0_i32_0, %c0_i32_1 : i32, i32, i32
  }
  func.func @transform_5(%arg0: i32) -> (i32, i32, i32) {
    %c0_i32 = arith.constant 0 : i32
    %c0_i32_0 = arith.constant 0 : i32
    %c0_i32_1 = arith.constant 0 : i32
    %c0_i32_2 = arith.constant 0 : i32
    return %c0_i32, %c0_i32_0, %c0_i32_1 : i32, i32, i32
  }
  func.func @transform_6(%arg0: i32) -> (i32, i32, i32) {
    %c0_i32 = arith.constant 0 : i32
    %c0_i32_0 = arith.constant 0 : i32
    %c0_i32_1 = arith.constant 0 : i32
    %c0_i32_2 = arith.constant 0 : i32
    return %c0_i32, %c0_i32_0, %c0_i32_1 : i32, i32, i32
  }
  func.func @transform_7(%arg0: i32) -> (i32, i32, i32) {
    %c0_i32 = arith.constant 0 : i32
    %c0_i32_0 = arith.constant 0 : i32
    %c0_i32_1 = arith.constant 0 : i32
    %c0_i32_2 = arith.constant 0 : i32
    return %c0_i32, %c0_i32_0, %c0_i32_1 : i32, i32, i32
  }
  func.func @transform_8(%arg0: i32) -> (i32, i32, i32) {
    %c0_i32 = arith.constant 0 : i32
    %c0_i32_0 = arith.constant 0 : i32
    %c0_i32_1 = arith.constant 0 : i32
    %c0_i32_2 = arith.constant 0 : i32
    return %c0_i32, %c0_i32_0, %c0_i32_1 : i32, i32, i32
  }
  func.func @transform_9(%arg0: i32) -> (i32, i32, i32) {
    %c0_i32 = arith.constant 0 : i32
    %c0_i32_0 = arith.constant 0 : i32
    %c0_i32_1 = arith.constant 0 : i32
    %c0_i32_2 = arith.constant 0 : i32
    return %c0_i32, %c0_i32_0, %c0_i32_1 : i32, i32, i32
  }
  func.func @transform_10(%arg0: i32) -> (i32, i32, i32) {
    %c0_i32 = arith.constant 0 : i32
    %c0_i32_0 = arith.constant 0 : i32
    %c0_i32_1 = arith.constant 0 : i32
    %c0_i32_2 = arith.constant 0 : i32
    return %c0_i32, %c0_i32_0, %c0_i32_1 : i32, i32, i32
  }
  func.func @transform_11(%arg0: i32) -> (i32, i32, i32) {
    %c0_i32 = arith.constant 0 : i32
    %c0_i32_0 = arith.constant 0 : i32
    %c0_i32_1 = arith.constant 0 : i32
    %c0_i32_2 = arith.constant 0 : i32
    return %c0_i32, %c0_i32_0, %c0_i32_1 : i32, i32, i32
  }
  func.func @transform_12(%arg0: i32) -> (i32, i32, i32) {
    %c0_i32 = arith.constant 0 : i32
    %c0_i32_0 = arith.constant 0 : i32
    %c0_i32_1 = arith.constant 0 : i32
    %c0_i32_2 = arith.constant 0 : i32
    return %c0_i32, %c0_i32_0, %c0_i32_1 : i32, i32, i32
  }
  func.func @transform_13(%arg0: i32) -> (i32, i32, i32) {
    %c0_i32 = arith.constant 0 : i32
    %c0_i32_0 = arith.constant 0 : i32
    %c0_i32_1 = arith.constant 0 : i32
    %c0_i32_2 = arith.constant 0 : i32
    return %c0_i32, %c0_i32_0, %c0_i32_1 : i32, i32, i32
  }
  func.func @transform_14(%arg0: i32) -> (i32, i32, i32) {
    %c0_i32 = arith.constant 0 : i32
    %c0_i32_0 = arith.constant 0 : i32
    %c0_i32_1 = arith.constant 0 : i32
    %c0_i32_2 = arith.constant 0 : i32
    return %c0_i32, %c0_i32_0, %c0_i32_1 : i32, i32, i32
  }
  func.func @transform_15(%arg0: i32) -> (i32, i32, i32) {
    %c0_i32 = arith.constant 0 : i32
    %c0_i32_0 = arith.constant 0 : i32
    %c0_i32_1 = arith.constant 0 : i32
    %c0_i32_2 = arith.constant 0 : i32
    return %c0_i32, %c0_i32_0, %c0_i32_1 : i32, i32, i32
  }
  func.func @transform_16(%arg0: i32) -> (i32, i32) {
    %c0_i32 = arith.constant 0 : i32
    %c0_i32_0 = arith.constant 0 : i32
    %c0_i32_1 = arith.constant 0 : i32
    return %c0_i32, %c0_i32_0 : i32, i32
  }
  func.func @transform_17(%arg0: i32) -> (i32, i32) {
    %c0_i32 = arith.constant 0 : i32
    %c0_i32_0 = arith.constant 0 : i32
    %c0_i32_1 = arith.constant 0 : i32
    return %c0_i32, %c0_i32_0 : i32, i32
  }
  func.func @transform_18(%arg0: i32) -> (i32, i32, i32) {
    %c0_i32 = arith.constant 0 : i32
    %c0_i32_0 = arith.constant 0 : i32
    %c0_i32_1 = arith.constant 0 : i32
    return %arg0, %c0_i32, %c0_i32_0 : i32, i32, i32
  }
}

</mosaic_0001>

<bundles_post_ra>
// kernel: vanilla_transformer_forward.1
= control target key start
LH: loop header
LB: loop body
LE: loop exit
PB: predicated region body
PF: predicated region fallthrough
CT: control target
= control target key end

     0   :  { %s2448_s27 = smov 0   ;;  %s2701_s0 = inlined_call_operand.vmem [shape: f32[2,8,32], index: 0, kind: input, shape index: {}]   ;;  %s2702_s1 = inlined_call_operand.vmem [shape: bf16[6,32,96], index: 1, kind: input, shape index: {}]   ;;  %s2703_s2 = inlined_call_operand.vmem [shape: f32[6,1,96], index: 2, kind: input, shape index: {}]   ;;  %s2704_s3 = inlined_call_operand.vmem [shape: bf16[6,32,32], index: 3, kind: input, shape index: {}]   ;;  %s2705_s4 = inlined_call_operand.vmem [shape: f32[6,1,32], index: 4, kind: input, shape index: {}]   ;;  %s2706_s5 = inlined_call_operand.vmem [shape: f32[6,1,32], index: 5, kind: input, shape index: {}]   ;;  %s2707_s6 = inlined_call_operand.vmem [shape: bf16[6,32,512], index: 6, kind: input, shape index: {}]   ;;  %s2708_s7 = inlined_call_operand.vmem [shape: f32[6,1,512], index: 7, kind: input, shape index: {}]   ;;  %s2709_s8 = inlined_call_operand.vmem [shape: bf16[6,512,32], index: 8, kind: input, shape index: {}]   ;;  %s2710_s9 = inlined_call_operand.vmem [shape: f32[6,1,32], index: 9, kind: input, shape index: {}]   ;;  %s2711_s10 = inlined_call_operand.vmem [shape: f32[6,1,32], index: 10, kind: input, shape index: {}]   ;;  %s2712_s11 = inlined_call_operand.vmem [shape: f32[6,1,32], index: 11, kind: input, shape index: {}]   ;;  %s2713_s12 = inlined_call_operand.vmem [shape: f32[6,1,32], index: 12, kind: input, shape index: {}]   ;;  %s2714_s13 = inlined_call_operand.vmem [shape: f32[6,1,32], index: 13, kind: input, shape index: {}]   ;;  %s2715_s14 = inlined_call_operand.vmem [shape: f32[6,1,32], index: 14, kind: input, shape index: {}]   ;;  %s2716_s15 = inlined_call_operand.vmem [shape: f32[6,1,32], index: 15, kind: input, shape index: {}]   ;;  %s2717_s16 = inlined_call_operand.vmem [shape: bf16[32,128], index: 16, kind: input, shape index: {}]   ;;  %s2718_s17 = inlined_call_operand.vmem [shape: f32[1,128], index: 17, kind: input, shape index: {}]   ;;  %s2719_s18 = inlined_call_operand.vmem [shape: f32[2,8,128], index: 18, kind: output, shape index: {}]  }
   0x1   :  { %2720 = sst [smem:[#allocation2_spill]] %s2701_s0 }
   0x2   :  { %2721 = sst [smem:[#allocation3_spill]] %s2702_s1 }
   0x3   :  { %2722 = sst [smem:[#allocation4_spill]] %s2703_s2 }
   0x4 LB: > { %s1964_s28 = sadd.s32 4294967295, %s2324_s27   ;;  %p1968_p0 = scmp.ge.s32.totalorder %s2324_s27, 1  ;;  %s2324_s27 = sphi %s2448_s27, %s28_s27  }
   0x5   : > { %p511_p1 = scmp.lt.s32.totalorder %s2324_s27, 3 }
   0x7   : > { %p512_p2 = pnand %p1968_p0, %p511_p1 }
   0x8   : > { %p563_p3 = scmp.lt.s32.totalorder (!%p512_p2), %s1964_s28, 1  ;;  %v573_v0 = vlaneseq (!%p512_p2)  ;;  %s2723_s19 = sld [smem:[#allocation2_spill]] (!%p512_p2) }
   0x9   : > { %515 = sbr.rel (%p512_p2) target bundleno = 3122 (0xc32), region = 92  ;;  %s2472_s2 = smov (!%p512_p2), 0  }
   0xa   : > { %v2456_v1 = vshrl.u32 (!%p512_p2), %v573_v0, 7  ;;  %v2458_v2 = vand.u32 (!%p512_p2), 127, %v573_v0 }
   0xc   : > { %vm577_vm0 = vcmp.le.s32.totalorder (!%p512_p2), %v2458_v2, %v2456_v1 }
  0x10   : > { %s2728_s28 = smov (!%p563_p3, %s1964_s28), 1 }
  0x11   : > { %s1969_s29 = sshll.u32 %s2728_s28, 3 }
  0x12   : > { %s566_s1 = scalar_lea.vmem %s2723_s19, %s1969_s29  ;;  %s2468_s22 = scalar_lea.vmem %s2719_s18, %s1969_s29 }
  0x13   : > { %v572_v3 = vld [vmem:[%s566_s1] sm:$0xff]  }
  0x14 LB: >> { %v2334_v4 = vmov 0.0   ;;  %vm2335_vm1 = vmmov 0   ;;  %s2050_s23 = sshll.u32 %s2332_s2, 4  ;;  %s2724_s26 = sld [smem:[#allocation3_spill]]  ;;  %vm613_vm2 = vcmask 261120   ;;  %v585_v7 = vpack.c.bf16 %v2328_v3, %v2328_v3  ;;  %s2332_s2 = sphi %s2472_s2, %s583_s2   ;;  %v2328_v3 = vphi %v572_v3, %v2726_v3  }
  0x15   : >> { %2123 = vmatprep.subr.bf16.mxu0 %v2334_v4  ;;  %2127 = vmatprep.mubr.msk.bf16.mxu0 %vm2335_vm1, %v2334_v4  ;;  %s2053_s29 = sshll.u32 %s2332_s2, 8  ;;  %s2494_s19 = scalar_lea.vmem %s2704_s3, %s2050_s23  ;;  %vm661_vm3 = vcmask 64512   ;;  %vm727_vm4 = vcmask 1043456   ;;  %vm1120_vm5 = vcmask 130048   ;;  %vm1122_vm6 = vcmask 195584  }
  0x16   : >> { %2131 = vmatprep.subr.bf16.mxu1 %v2334_v4  ;;  %2133 = vmatprep.mubr.msk.bf16.mxu1 %vm2335_vm1, %v2334_v4  ;;  %s2499_s21 = scalar_lea.vmem %s2709_s8, %s2053_s29  ;;  %s2725_s25 = sld [smem:[#allocation4_spill]] }
  0x17   : >> { %s2337_s29 = smov 96   ;;  %s2338_s30 = smov 80  }
  0x18   : >> { %s2339_s0 = smov 88   ;;  %s2340_s1 = smov 72  }
  0x19   : >> { %s2341_s20 = smov 112   ;;  %s2343_s24 = smov 56  }
  0x1a   : >> { %s588_s28 = scalar_lea.vmem %s2724_s26, %s2050_s23  ;;  %s2342_s23 = smov 104  }
  0x1b   : >> { %v2238_v5 = vld [vmem:[%s588_s28] sm:$0xff]   ;;  %v2239_v6 = vld [vmem:[%s588_s28 + $0x8] sm:$0xff]   ;;  %s2336_s28 = smov 120  }
  0x1c   : >> { %2124 = vmatpush3.bf16.msra.mxu0 %v2238_v5  ;;  %s593_s26 = scalar_lea.vmem %s2725_s25, %s2332_s2  ;;  %s2344_s25 = smov 64  }
  0x1d   : >> { %2125 = vmatprep.subr.bf16.mxu0 %v2334_v4  ;;  %v1973_v8 = vld [vmem:[%s593_s26] ss:$0 sm:$0xff]  ;;  %s2345_s26 = smov 40  }
  0x20   : >> { %2126 = vmatpush3.bf16.msra.mxu0 %v2239_v6 }
  0x21   : >> { %2137 = vmatprep.subr.bf16.mxu0 %v2334_v4 }
  0x23   : >> { %2128 = vmatmul.mubr.msk.bf16.vlgmr.msra.gmra.mrb[0].mxu0 %vm613_vm2, %v585_v7 }
  0x24   : >> { %2139 = vmatprep.mubr.msk.bf16.mxu0 %vm2335_vm1, %v2334_v4 }
  0xf6   : >> { %v651_v9 = vpop.f32.mrb[0].mxu0 }
  0xf7   : >> { %v652_v10 = vadd.f32 %v1973_v8, %v651_v9  ;;  %v2129_v11 = vpop.f32.mrb[1].mxu0 }
  0xf8   : >> { %v654_v12 = vpop.f32.mrb[2].mxu0 }
  0xf9   : >> { %v2512_v13 = vpack.c.bf16 %v652_v10, %v652_v10  ;;  %v2130_v14 = vpop.f32.mrb[3].mxu0 }
  0xfb   : >> { %771 = vrot.lane.b32.xlu1 %v2512_v13, %s2336_s28  ;;  %659 = vrot.lane.b32.xlu0 %v2512_v13, %s2337_s29  ;;  %s2346_s28 = smov 48   ;;  %s2347_s29 = smov 8  }
  0xff   : >> { %885 = vrot.lane.b32.xlu1 %v2512_v13, %s2338_s30  ;;  %773 = vrot.lane.b32.xlu0 %v2512_v13, %s2339_s0  ;;  %s2348_s30 = smov 16   ;;  %s2349_s0 = smov 24  }
 0x103   : >> { %997 = vrot.lane.b32.xlu1 %v2512_v13, %s2340_s1  ;;  %883 = vrot.lane.b32.xlu0 %v2512_v13, %s2341_s20  ;;  %s1131_s20 = scalar_lea.vmem %s2705_s4, %s2332_s2  ;;  %s2052_s1 = sshll.u32 %s2332_s2, 6 }
 0x107   : >> { %995 = vrot.lane.b32.xlu0 %v2512_v13, %s2342_s23 }
 0x16d   : >> { %v660_v15 = vpop.permute.xlu0 %659  ;;  %v772_v18 = vpop.permute.xlu1 %771 }
 0x16e   : >> { %v666_v16 = vsel %vm661_vm3, %v660_v15, 0 }
 0x16f   : >> { %2132 = vmatpush3.bf16.xpose.msra.mxu1 %v666_v16 }
 0x170   : >> { %2143 = vmatprep.subr.bf16.mxu1 %v2334_v4 }
 0x171   : >> { %v774_v17 = vpop.permute.xlu0 %773  ;;  %v886_v20 = vpop.permute.xlu1 %885 }
 0x172   : >> { %v779_v19 = vsel %vm661_vm3, %v774_v17, 0  ;;  %v891_v21 = vsel %vm661_vm3, %v886_v20, 0 }
 0x175   : >> { %v998_v22 = vpop.permute.xlu1 %997  ;;  %v884_v23 = vpop.permute.xlu0 %883 }
 0x176   : >> { %2134 = vmatmul.mubr.msk.bf16.vlgmr.msra.gmra.mrb[0].mxu1 %vm661_vm3, %v2512_v13  ;;  %v1003_v24 = vsel %vm661_vm3, %v998_v22, 0 }
 0x177   : >> { %2144 = vmatpush3.bf16.xpose.msra.mxu1 %v779_v19  ;;  %2145 = vmatprep.mubr.msk.bf16.mxu1 %vm2335_vm1, %v2334_v4 }
 0x178   : >> { %2155 = vmatprep.subr.bf16.mxu1 %v2334_v4 }
 0x179   : >> { %v996_v25 = vpop.permute.xlu0 %995 }
 0x17e   : >> { %2146 = vmatmul.mubr.msk.bf16.vlgmr.msra.gmra.mrb[4].mxu1 %vm661_vm3, %v772_v18 }
 0x17f   : >> { %2156 = vmatpush3.bf16.xpose.msra.mxu1 %v891_v21  ;;  %2157 = vmatprep.mubr.msk.bf16.mxu1 %vm2335_vm1, %v2334_v4 }
 0x180   : >> { %2167 = vmatprep.subr.bf16.mxu1 %v2334_v4 }
 0x186   : >> { %2158 = vmatmul.mubr.msk.bf16.vlgmr.msra.gmra.mrb[8].mxu1 %vm661_vm3, %v884_v23 }
 0x187   : >> { %2168 = vmatpush3.bf16.xpose.msra.mxu1 %v1003_v24  ;;  %2169 = vmatprep.mubr.msk.bf16.mxu1 %vm2335_vm1, %v2334_v4 }
 0x188   : >> { %2179 = vmatprep.subr.bf16.mxu1 %v2334_v4 }
 0x18e   : >> { %2170 = vmatmul.mubr.msk.bf16.vlgmr.msra.gmra.mrb[12].mxu1 %vm661_vm3, %v996_v25 }
 0x18f   : >> { %2183 = vmatprep.mubr.msk.bf16.mxu1 %vm2335_vm1, %v2334_v4 }
 0x249   : >> { %v702_v26 = vpop.f32.mrb[0].mxu1 }
 0x24a   : >> { %v708_v27 = vmul.f32 0.35355338, %v702_v26  ;;  %v2135_v28 = vpop.f32.mrb[1].mxu1 }
 0x24b   : >> { %v705_v29 = vpop.f32.mrb[2].mxu1 }
 0x24c   : >> { %v709_v30 = vsel %vm577_vm0, %v708_v27, -1e+30  ;;  %v2136_v31 = vpop.f32.mrb[3].mxu1 }
 0x24d   : >> { %v710_v32 = vsel %vm661_vm3, %v709_v30, -inf }
 0x24e   : >> { %711 = vmax.xlane.f32.xlu1 %v710_v32 }
 0x251   : >> { %v815_v33 = vpop.f32.mrb[4].mxu1 }
 0x252   : >> { %v821_v34 = vmul.f32 0.35355338, %v815_v33  ;;  %v2147_v35 = vpop.f32.mrb[5].mxu1 }
 0x253   : >> { %v818_v36 = vpop.f32.mrb[6].mxu1 }
 0x254   : >> { %v822_v37 = vsel %vm577_vm0, %v821_v34, -1e+30  ;;  %v2148_v38 = vpop.f32.mrb[7].mxu1 }
 0x255   : >> { %v823_v39 = vsel %vm661_vm3, %v822_v37, -inf }
 0x256   : >> { %824 = vmax.xlane.f32.xlu0 %v823_v39 }
 0x259   : >> { %v927_v40 = vpop.f32.mrb[8].mxu1 }
 0x25a   : >> { %v933_v41 = vmul.f32 0.35355338, %v927_v40  ;;  %v2159_v42 = vpop.f32.mrb[9].mxu1 }
 0x25b   : >> { %v930_v43 = vpop.f32.mrb[10].mxu1 }
 0x25c   : >> { %v934_v44 = vsel %vm577_vm0, %v933_v41, -1e+30  ;;  %v2160_v45 = vpop.f32.mrb[11].mxu1 }
 0x25d   : >> { %v935_v46 = vsel %vm661_vm3, %v934_v44, -inf }
 0x25e   : >> { %936 = vmax.xlane.f32.xlu0 %v935_v46  ;;  %v2240_v46 = vld [vmem:[%s2494_s19] sm:$0xff]  }
 0x25f   : >> { %2180 = vmatpush3.bf16.msra.mxu1 %v2240_v46 }
 0x260   : >> { %2181 = vmatprep.subr.bf16.mxu1 %v2334_v4 }
 0x261   : >> { %v1039_v47 = vpop.f32.mrb[12].mxu1 }
 0x262   : >> { %v1045_v48 = vmul.f32 0.35355338, %v1039_v47  ;;  %v2171_v49 = vpop.f32.mrb[13].mxu1  ;;  %v2241_v47 = vld [vmem:[%s2494_s19 + $0x8] sm:$0xff]   ;;  %s1227_s19 = scalar_lea.vmem %s2706_s5, %s2332_s2 }
 0x263   : >> { %v1042_v50 = vpop.f32.mrb[14].mxu1  ;;  %2182 = vmatpush3.bf16.msra.mxu1 %v2241_v47 }
 0x264   : >> { %v1046_v51 = vsel %vm577_vm0, %v1045_v48, -1e+30  ;;  %v2172_v52 = vpop.f32.mrb[15].mxu1 }
 0x265   : >> { %v1047_v53 = vsel %vm661_vm3, %v1046_v51, -inf }
 0x266   : >> { %1048 = vmax.xlane.f32.xlu1 %v1047_v53 }
 0x2db   : >> { %v712_v54 = vpop.xlane.xlu1 %711 }
 0x2dc   : >> { %v713_v55 = vsub.f32 %v709_v30, %v712_v54 }
 0x2de   : >> { %v714_v56 = vmul.f32 1.442695, %v713_v55 }
 0x2e0   : >> { %2286 = vpow2.f32 %v714_v56 }
 0x2e3   : >> { %v825_v57 = vpop.xlane.xlu0 %824 }
 0x2e4   : >> { %v826_v58 = vsub.f32 %v822_v37, %v825_v57 }
 0x2e6   : >> { %v827_v59 = vmul.f32 1.442695, %v826_v58 }
 0x2e8   : >> { %2288 = vpow2.f32 %v827_v59 }
 0x2ea   : >> { %v2287_v60 = vpop.eup %2286 }
 0x2eb   : >> { %v937_v61 = vpop.xlane.xlu0 %936  ;;  %v716_v62 = vsel %vm661_vm3, %v2287_v60, 0.0 }
 0x2ec   : >> { %v938_v63 = vsub.f32 %v934_v44, %v937_v61  ;;  %717 = vadd.xlane.f32.xlu0 %v716_v62  ;;  %v1986_v62 = vld [vmem:[%s1131_s20] ss:$0 sm:$0xff] }
 0x2ee   : >> { %v939_v0 = vmul.f32 1.442695, %v938_v63 }
 0x2f0   : >> { %2290 = vpow2.f32 %v939_v0 }
 0x2f2   : >> { %v2289_v5 = vpop.eup %2288 }
 0x2f3   : >> { %v829_v6 = vsel %vm661_vm3, %v2289_v5, 0.0  ;;  %v1049_v9 = vpop.xlane.xlu1 %1048 }
 0x2f4   : >> { %830 = vadd.xlane.f32.xlu1 %v829_v6  ;;  %v1050_v10 = vsub.f32 %v1046_v51, %v1049_v9 }
 0x2f6   : >> { %v1051_v11 = vmul.f32 1.442695, %v1050_v10 }
 0x2f8   : >> { %2292 = vpow2.f32 %v1051_v11 }
 0x2fa   : >> { %v2291_v7 = vpop.eup %2290 }
 0x2fb   : >> { %v941_v8 = vsel %vm661_vm3, %v2291_v7, 0.0 }
 0x2fc   : >> { %942 = vadd.xlane.f32.xlu0 %v941_v8 }
 0x302   : >> { %v2293_v12 = vpop.eup %2292 }
 0x303   : >> { %v1053_v14 = vsel %vm661_vm3, %v2293_v12, 0.0 }
 0x305   : >> { %835 = vrot.lane.b32.xlu1 %v2512_v13, %s2343_s24  ;;  %s1270_s24 = scalar_lea.vmem %s2707_s6, %s2052_s1 }
 0x312   : >> { %722 = vrot.lane.b32.xlu0 %v2512_v13, %s2344_s25  ;;  %s1195_s25 = scalar_lea.vmem %s2711_s10, %s2332_s2 }
 0x316   : >> { %1059 = vrot.lane.b32.xlu0 %v2512_v13, %s2345_s26 }
 0x329   : >> { %1054 = vadd.xlane.f32.xlu1 %v1053_v14 }
 0x33a   : >> { %947 = vrot.lane.b32.xlu1 %v2512_v13, %s2346_s28  ;;  %s1236_s28 = scalar_lea.vmem %s2713_s12, %s2332_s2 }
 0x33b   : >> { %v1993_v46 = vld [vmem:[%s1236_s28] ss:$0 sm:$0xff] }
 0x379   : >> { %v718_v15 = vpop.xlane.xlu0 %717 }
 0x37a   : >> { %2294 = vrcp.f32 %v718_v15 }
 0x381   : >> { %v831_v16 = vpop.xlane.xlu1 %830 }
 0x382   : >> { %2296 = vrcp.f32 %v831_v16 }
 0x384   : >> { %v2295_v17 = vpop.eup %2294 }
 0x385   : >> { %v720_v19 = vmul.f32 %v2295_v17, %v2287_v60  ;;  %v836_v22 = vpop.permute.xlu1 %835 }
 0x386   : >> { %v841_v25 = vsel %vm727_vm4, %v836_v22, 0 }
 0x387   : >> { %v721_v23 = vpack.c.bf16 %v720_v19, %v720_v19  ;;  %v1990_v19 = vld [vmem:[%s1195_s25] ss:$0 sm:$0xff]  ;;  %s1502_s25 = scalar_lea.vmem %s2710_s9, %s2332_s2 }
 0x389   : >> { %v943_v18 = vpop.xlane.xlu0 %942 }
 0x38a   : >> { %2298 = vrcp.f32 %v943_v18 }
 0x38c   : >> { %v2297_v24 = vpop.eup %2296 }
 0x38d   : >> { %v723_v20 = vpop.permute.xlu0 %722  ;;  %v833_v13 = vmul.f32 %v2297_v24, %v2289_v5 }
 0x38e   : >> { %v729_v21 = vsel %vm727_vm4, %v723_v20, 0 }
 0x38f   : >> { %2138 = vmatpush3.bf16.msra.mxu0 %v729_v21  ;;  %v834_v26 = vpack.c.bf16 %v833_v13, %v833_v13 }
 0x390   : >> { %2149 = vmatprep.subr.bf16.mxu0 %v2334_v4 }
 0x391   : >> { %v1060_v32 = vpop.permute.xlu0 %1059 }
 0x392   : >> { %2140 = vmatmul.mubr.msk.bf16.vlgmr.msra.gmra.mrb[4].mxu0 %vm661_vm3, %v721_v23  ;;  %v1065_v34 = vsel %vm727_vm4, %v1060_v32, 0  ;;  %v1992_v23 = vld [vmem:[%s1227_s19] ss:$0 sm:$0xff]  ;;  %s1971_s19 = sshll.u32 %s2332_s2, 2 }
 0x393   : >> { %2150 = vmatpush3.bf16.msra.mxu0 %v841_v25  ;;  %2151 = vmatprep.mubr.msk.bf16.mxu0 %vm2335_vm1, %v2334_v4  ;;  %v2242_v32 = vld [vmem:[%s1270_s24] ss:$16 sps:$4 sm:$0xff]   ;;  %s1279_s23 = scalar_lea.vmem %s2708_s7, %s1971_s19  ;;  %s1785_s19 = scalar_lea.vmem %s2716_s15, %s2332_s2 }
 0x394   : >> { %2161 = vmatprep.subr.bf16.mxu0 %v2334_v4  ;;  %v2299_v27 = vpop.eup %2298 }
 0x395   : >> { %v945_v29 = vmul.f32 %v2299_v27, %v2291_v7 }
 0x397   : >> { %v946_v33 = vpack.c.bf16 %v945_v29, %v945_v29 }
 0x39a   : >> { %2152 = vmatmul.mubr.msk.bf16.vlgmr.msra.gmra.mrb[8].mxu0 %vm661_vm3, %v834_v26 }
 0x39b   : >> { %2163 = vmatprep.mubr.msk.bf16.mxu0 %vm2335_vm1, %v2334_v4 }
 0x3b6   : >> { %v1055_v28 = vpop.xlane.xlu1 %1054 }
 0x3b7   : >> { %2300 = vrcp.f32 %v1055_v28 }
 0x3ba   : >> { %v948_v30 = vpop.permute.xlu1 %947 }
 0x3bb   : >> { %v953_v31 = vsel %vm727_vm4, %v948_v30, 0 }
 0x3bc   : >> { %2162 = vmatpush3.bf16.msra.mxu0 %v953_v31  ;;  %v2244_v31 = vld [vmem:[%s1270_s24 + $0x4] ss:$16 sps:$4 sm:$0xff]  }
 0x3bd   : >> { %2173 = vmatprep.subr.bf16.mxu0 %v2334_v4 }
 0x3bf   : >> { %2164 = vmatmul.mubr.msk.bf16.vlgmr.msra.gmra.mrb[12].mxu0 %vm661_vm3, %v946_v33  ;;  %v2245_v33 = vld [vmem:[%s1270_s24 + $0x8] ss:$16 sps:$4 sm:$0xff]  }
 0x3c0   : >> { %2174 = vmatpush3.bf16.msra.mxu0 %v1065_v34  ;;  %2175 = vmatprep.mubr.msk.bf16.mxu0 %vm2335_vm1, %v2334_v4  ;;  %v2247_v34 = vld [vmem:[%s1270_s24 + $0xc] ss:$16 sps:$4 sm:$0xff]  }
 0x3c1   : >> { %v2301_v35 = vpop.eup %2300  ;;  %1345 = vmatprep.subr.bf16.mxu0 %v2244_v31  ;;  %1386 = vmatprep.subr.bf16.mxu1 %v2247_v34 }
 0x3c2   : >> { %v1057_v36 = vmul.f32 %v2301_v35, %v2293_v12  ;;  %v2248_v35 = vld [vmem:[%s1270_s24 + $0x20] ss:$16 sps:$4 sm:$0xff]  }
 0x3c4   : >> { %v1058_v37 = vpack.c.bf16 %v1057_v36, %v1057_v36  ;;  %v2250_v36 = vld [vmem:[%s1270_s24 + $0x24] ss:$16 sps:$4 sm:$0xff]  }
 0x3c7   : >> { %2176 = vmatmul.mubr.msk.bf16.vlgmr.msra.gmra.mrb[16].mxu0 %vm661_vm3, %v1058_v37  ;;  %v2251_v37 = vld [vmem:[%s1270_s24 + $0x28] ss:$16 sps:$4 sm:$0xff]  }
 0x3c8   : >> { %1346 = vmatpush1.bf16.msra.mxu0 %v2242_v32 }
 0x3c9   : >> { %1347 = vmatprep.subr.bf16.mxu0 %v2250_v36 }
 0x3cc   : >> { %1348 = vmatpush1.bf16.msra.mxu0 %v2248_v35 }
 0x465   : >> { %v765_v38 = vpop.f32.mrb[4].mxu0 }
 0x466   : >> { %v2141_v39 = vpop.f32.mrb[5].mxu0 }
 0x467   : >> { %v768_v40 = vpop.f32.mrb[6].mxu0  ;;  %v2350_v39 = vmov 0  }
 0x468   : >> { %v2142_v41 = vpop.f32.mrb[7].mxu0  ;;  %1377 = vmatprep.mubr.bf16.mxu0 %v2350_v39  ;;  %v2254_v40 = vld [vmem:[%s2499_s21 + $0x40] sm:$0xff]  }
 0x469   : >> { %v2255_v41 = vld [vmem:[%s2499_s21 + $0xc0] sm:$0xff]   ;;  %2076 = vmatprep.subr.bf16.mxu0 %v2254_v40 }
 0x46d   : >> { %v877_v42 = vpop.f32.mrb[8].mxu0 }
 0x46e   : >> { %1108 = vrot.lane.b32.xlu1 %v877_v42, %s2347_s29  ;;  %v2153_v43 = vpop.f32.mrb[9].mxu0  ;;  %s1197_s29 = scalar_lea.vmem %s2712_s11, %s2332_s2 }
 0x46f   : >> { %v880_v44 = vpop.f32.mrb[10].mxu0  ;;  %v1991_v21 = vld [vmem:[%s1197_s29] ss:$0 sm:$0xff]  ;;  %s1783_s29 = scalar_lea.vmem %s2715_s14, %s2332_s2 }
 0x470   : >> { %v2154_v45 = vpop.f32.mrb[11].mxu0 }
 0x492   : >> { %v989_v48 = vpop.f32.mrb[12].mxu0 }
 0x493   : >> { %1112 = vrot.lane.b32.xlu0 %v989_v48, %s2348_s30  ;;  %v2165_v49 = vpop.f32.mrb[13].mxu0 }
 0x494   : >> { %v992_v50 = vpop.f32.mrb[14].mxu0 }
 0x495   : >> { %v2166_v51 = vpop.f32.mrb[15].mxu0 }
 0x496   : >> { %v2256_v51 = vld [vmem:[%s2499_s21] sm:$0xff]  }
 0x49a   : >> { %v1101_v52 = vpop.f32.mrb[16].mxu0 }
 0x49b   : >> { %1116 = vrot.lane.b32.xlu1 %v1101_v52, %s2349_s0  ;;  %v2177_v53 = vpop.f32.mrb[17].mxu0  ;;  %s1238_s0 = scalar_lea.vmem %s2714_s13, %s2332_s2  ;;  %v2257_v52 = vld [vmem:[%s2499_s21 + $0x80] sm:$0xff]   ;;  %s583_s2 = sadd.s32 1, %s2332_s2  }
 0x49c   : >> { %v1104_v54 = vpop.f32.mrb[18].mxu0  ;;  %v1994_v48 = vld [vmem:[%s1238_s0] ss:$0 sm:$0xff]  ;;  %p580_p4 = scmp.ge.s32.totalorder %s583_s2, 6  }
 0x49d   : >> { %v2178_v55 = vpop.f32.mrb[19].mxu0  ;;  %v2258_v54 = vld [vmem:[%s2499_s21 + $0x48] sm:$0xff]   ;;  %vm2352_vm7 = vmmov (%p580_p4), 0  }
 0x49e   : >> { %v2259_v55 = vld [vmem:[%s2499_s21 + $0xc8] sm:$0xff]  }
 0x4e0   : >> { %v1109_v56 = vpop.permute.xlu1 %1108 }
 0x4e1   : >> { %v1119_v4 = vsel %vm661_vm3, %v765_v38, %v1109_v56  ;;  %v2253_v38 = vld [vmem:[%s1270_s24 + $0x2c] ss:$16 sps:$4 sm:$0xff]  }
 0x4e2   : >> { %v2260_v56 = vld [vmem:[%s2499_s21 + $0x8] sm:$0xff]  }
 0x505   : >> { %v1113_v57 = vpop.permute.xlu0 %1112 }
 0x506   : >> { %v1121_v58 = vsel %vm1120_vm5, %v1119_v4, %v1113_v57  ;;  %v2261_v57 = vld [vmem:[%s2499_s21 + $0x88] sm:$0xff]   ;;  %v2262_v4 = vld [vmem:[%s2499_s21 + $0x50] sm:$0xff]  }
 0x50d   : >> { %v1117_v59 = vpop.permute.xlu1 %1116 }
 0x50e   : >> { %v1123_v60 = vsel %vm1122_vm6, %v1121_v58, %v1117_v59  ;;  %v2263_v58 = vld [vmem:[%s2499_s21 + $0xd0] sm:$0xff]  }
 0x50f   : >> { %v1124_v61 = vpack.c.bf16 %v1123_v60, %v1123_v60  ;;  %v2264_v59 = vld [vmem:[%s2499_s21 + $0x10] sm:$0xff]  }
 0x510   : >> { %v2265_v60 = vld [vmem:[%s2499_s21 + $0x90] sm:$0xff]  }
 0x511   : >> { %2184 = vmatmul.mubr.msk.bf16.vlgmr.msra.gmra.mrb[16].mxu1 %vm613_vm2, %v1124_v61  ;;  %v2266_v61 = vld [vmem:[%s2499_s21 + $0x58] sm:$0xff]  }
 0x512   : >> { %1387 = vmatpush1.bf16.msra.mxu1 %v2245_v33  ;;  %1418 = vmatprep.mubr.bf16.mxu1 %v2350_v39 }
 0x513   : >> { %1388 = vmatprep.subr.bf16.mxu1 %v2253_v38 }
 0x516   : >> { %1389 = vmatpush1.bf16.msra.mxu1 %v2251_v37 }
 0x517   : >> { %2098 = vmatprep.subr.bf16.mxu1 %v2255_v41 }
 0x5e4   : >> { %v1188_v63 = vpop.f32.mrb[16].mxu1 }
 0x5e5   : >> { %v1189_v0 = vadd.f32 %v1986_v62, %v1188_v63  ;;  %v2185_v5 = vpop.f32.mrb[17].mxu1  ;;  %v2267_v62 = vld [vmem:[%s2499_s21 + $0xd8] sm:$0xff]  }
 0x5e6   : >> { %v1191_v6 = vpop.f32.mrb[18].mxu1  ;;  %v2268_v63 = vld [vmem:[%s2499_s21 + $0x18] sm:$0xff]   ;;  %v2270_v5 = vld [vmem:[%s2499_s21 + $0x60] sm:$0xff]  }
 0x5e7   : >> { %v2186_v7 = vpop.f32.mrb[19].mxu1  ;;  %v1194_v8 = vadd.f32 %v2328_v3, %v1189_v0  ;;  %v2269_v0 = vld [vmem:[%s2499_s21 + $0x98] sm:$0xff]   ;;  %v2271_v6 = vld [vmem:[%s2499_s21 + $0xe0] sm:$0xff]  }
 0x5e8   : >> { %v2272_v7 = vld [vmem:[%s2499_s21 + $0x20] sm:$0xff]  }
 0x5e9   : >> { %v1199_v9 = vsel %vm613_vm2, %v1194_v8, 0.0 }
 0x5ea   : >> { %1200 = vadd.xlane.f32.xlu0 %v1199_v9  ;;  %v2274_v9 = vld [vmem:[%s2499_s21 + $0x68] sm:$0xff]  }
 0x677   : >> { %v1201_v10 = vpop.xlane.xlu0 %1200 }
 0x678   : >> { %v1203_v11 = vmul.f32 0.03125, %v1201_v10  ;;  %v2275_v10 = vld [vmem:[%s2499_s21 + $0xe8] sm:$0xff]  }
 0x67a   : >> { %v1204_v12 = vsub.f32 %v1194_v8, %v1203_v11  ;;  %v2273_v8 = vld [vmem:[%s2499_s21 + $0xa0] sm:$0xff]   ;;  %v2276_v11 = vld [vmem:[%s2499_s21 + $0x28] sm:$0xff]  }
 0x67c   : >> { %v1205_v14 = vmul.f32 %v1204_v12, %v1204_v12 }
 0x67e   : >> { %v1206_v15 = vsel %vm613_vm2, %v1205_v14, 0.0  ;;  %v2278_v14 = vld [vmem:[%s2499_s21 + $0x70] sm:$0xff]  }
 0x67f   : >> { %1207 = vadd.xlane.f32.xlu1 %v1206_v15  ;;  %v2279_v15 = vld [vmem:[%s2499_s21 + $0xf0] sm:$0xff]  }
 0x70c   : >> { %v1208_v16 = vpop.xlane.xlu1 %1207 }
 0x70d   : >> { %v1209_v17 = vmul.f32 0.03125, %v1208_v16  ;;  %v2280_v16 = vld [vmem:[%s2499_s21 + $0x30] sm:$0xff]  }
 0x70f   : >> { %v1210_v18 = vadd.f32 1e-05, %v1209_v17  ;;  %v2281_v17 = vld [vmem:[%s2499_s21 + $0xb0] sm:$0xff]  }
 0x711   : >> { %2302 = vrsqrt.f32 %v1210_v18  ;;  %v2282_v18 = vld [vmem:[%s2499_s21 + $0x78] sm:$0xff]  }
 0x71b   : >> { %v2303_v3 = vpop.eup %2302 }
 0x71c   : >> { %v1212_v20 = vmul.f32 %v2303_v3, %v1204_v12  ;;  %v2277_v12 = vld [vmem:[%s2499_s21 + $0xa8] sm:$0xff]   ;;  %v2283_v3 = vld [vmem:[%s2499_s21 + $0xf8] sm:$0xff]  }
 0x71e   : >> { %v1219_v22 = vmul.f32 %v1990_v19, %v1212_v20  ;;  %v2284_v19 = vld [vmem:[%s2499_s21 + $0x38] sm:$0xff]  }
 0x71f   : >> { %v2285_v20 = vld [vmem:[%s2499_s21 + $0xb8] sm:$0xff]  }
 0x720   : >> { %v1226_v24 = vadd.f32 %v1991_v21, %v1219_v22  ;;  %v1284_v21 = vsub.s32 0, %v2456_v1  ;;  %v1292_v22 = vsub.s32 2, %v2456_v1 }
 0x722   : >> { %v1235_v25 = vadd.f32 %v1992_v23, %v1226_v24  ;;  %v1280_v23 = vld [vmem:[%s1279_s23] sm:$0xf]  ;;  %v1288_v24 = vsub.s32 1, %v2456_v1 }
 0x724   : >> { %v1240_v13 = vsel %vm613_vm2, %v1235_v25, 0.0 }
 0x725   : >> { %1241 = vadd.xlane.f32.xlu0 %v1240_v13  ;;  %v1285_v13 = vrot.slane %v1280_v23, %v1284_v21 }
 0x7b2   : >> { %v1242_v26 = vpop.xlane.xlu0 %1241 }
 0x7b3   : >> { %v1243_v27 = vmul.f32 0.03125, %v1242_v26  ;;  %v1293_v26 = vrot.slane %v1280_v23, %v1292_v22 }
 0x7b5   : >> { %v1244_v28 = vsub.f32 %v1235_v25, %v1243_v27  ;;  %v1296_v25 = vsub.s32 3, %v2456_v1  ;;  %v1289_v27 = vrot.slane %v1280_v23, %v1288_v24  ;;  %v2044_v1 = vld [vmem:[%s2718_s17] ss:$0 sm:$0xff] (%p580_p4) }
 0x7b7   : >> { %v1245_v29 = vmul.f32 %v1244_v28, %v1244_v28 }
 0x7b9   : >> { %v1246_v30 = vsel %vm613_vm2, %v1245_v29, 0.0 }
 0x7ba   : >> { %1247 = vadd.xlane.f32.xlu0 %v1246_v30 }
 0x847   : >> { %v1248_v42 = vpop.xlane.xlu0 %1247 }
 0x848   : >> { %v1249_v43 = vmul.f32 0.03125, %v1248_v42 }
 0x84a   : >> { %v1250_v44 = vadd.f32 1e-05, %v1249_v43 }
 0x84c   : >> { %2304 = vrsqrt.f32 %v1250_v44 }
 0x856   : >> { %v2305_v45 = vpop.eup %2304 }
 0x857   : >> { %v1252_v47 = vmul.f32 %v2305_v45, %v1244_v28  ;;  %v1297_v28 = vrot.slane %v1280_v23, %v1296_v25 }
 0x859   : >> { %v1259_v49 = vmul.f32 %v1993_v46, %v1252_v47 }
 0x85b   : >> { %v2623_v50 = vadd.f32 %v1994_v48, %v1259_v49 }
 0x85d   : >> { %v1267_v53 = vpack.c.bf16 %v2623_v50, %v2623_v50 }
 0x85f   : >> { %2005 = vmatmul.mubr.msk.bf16.vlgmr.msra.gmra.mrb[20].mxu0 %vm613_vm2, %v1267_v53  ;;  %2006 = vmatmul.mubr.msk.bf16.vlgmr.msra.gmra.mrb[20].mxu1 %vm613_vm2, %v1267_v53 }
 0x860   : >> { %2077 = vmatpush3.bf16.msra.mxu0 %v2256_v51  ;;  %2099 = vmatpush3.bf16.msra.mxu1 %v2257_v52  ;;  %v2009_v52 = vld [vmem:[%s1502_s25] ss:$0 sm:$0xff] }
 0x861   : >> { %2078 = vmatprep.subr.bf16.mxu0 %v2258_v54  ;;  %2100 = vmatprep.subr.bf16.mxu1 %v2259_v55 }
 0x864   : >> { %2079 = vmatpush3.bf16.msra.mxu0 %v2260_v56  ;;  %2101 = vmatpush3.bf16.msra.mxu1 %v2261_v57 }
 0x865   : >> { %2080 = vmatprep.subr.bf16.mxu0 %v2262_v4  ;;  %2102 = vmatprep.subr.bf16.mxu1 %v2263_v58 }
 0x868   : >> { %2081 = vmatpush3.bf16.msra.mxu0 %v2264_v59  ;;  %2103 = vmatpush3.bf16.msra.mxu1 %v2265_v60 }
 0x869   : >> { %2082 = vmatprep.subr.bf16.mxu0 %v2266_v61  ;;  %2104 = vmatprep.subr.bf16.mxu1 %v2267_v62 }
 0x86c   : >> { %2083 = vmatpush3.bf16.msra.mxu0 %v2268_v63  ;;  %2105 = vmatpush3.bf16.msra.mxu1 %v2269_v0 }
 0x86d   : >> { %2084 = vmatprep.subr.bf16.mxu0 %v2270_v5  ;;  %2106 = vmatprep.subr.bf16.mxu1 %v2271_v6 }
 0x870   : >> { %2085 = vmatpush3.bf16.msra.mxu0 %v2272_v7  ;;  %2107 = vmatpush3.bf16.msra.mxu1 %v2273_v8 }
 0x871   : >> { %2086 = vmatprep.subr.bf16.mxu0 %v2274_v9  ;;  %2108 = vmatprep.subr.bf16.mxu1 %v2275_v10 }
 0x874   : >> { %2087 = vmatpush3.bf16.msra.mxu0 %v2276_v11  ;;  %2109 = vmatpush3.bf16.msra.mxu1 %v2277_v12  ;;  %v2042_v12 = vld [vmem:[%s1783_s29] ss:$0 sm:$0xff] }
 0x875   : >> { %2088 = vmatprep.subr.bf16.mxu0 %v2278_v14  ;;  %2110 = vmatprep.subr.bf16.mxu1 %v2279_v15  ;;  %v2043_v15 = vld [vmem:[%s1785_s19] ss:$0 sm:$0xff] }
 0x878   : >> { %2089 = vmatpush3.bf16.msra.mxu0 %v2280_v16  ;;  %2111 = vmatpush3.bf16.msra.mxu1 %v2281_v17 }
 0x879   : >> { %2090 = vmatprep.subr.bf16.mxu0 %v2282_v18  ;;  %2112 = vmatprep.subr.bf16.mxu1 %v2283_v3  ;;  %v2308_v18 = vld [vmem:[%s2717_s16] sm:$0xff] (%p580_p4)  }
 0x87c   : >> { %2091 = vmatpush3.bf16.msra.mxu0 %v2284_v19  ;;  %2113 = vmatpush3.bf16.msra.mxu1 %v2285_v20  ;;  %v2309_v19 = vld [vmem:[%s2717_s16 + $0x8] sm:$0xff] (%p580_p4)  }
 0x932   : >> { %v1379_v29 = vpop.f32.mrb[20].mxu0  ;;  %v1420_v30 = vpop.f32.mrb[20].mxu1 }
 0x933   : >> { %v1380_v31 = vadd.f32 %v1379_v29, %v1285_v13  ;;  %v1421_v32 = vadd.f32 %v1420_v30, %v1293_v26  ;;  %v1381_v33 = vpop.f32.mrb[21].mxu0  ;;  %v1422_v34 = vpop.f32.mrb[21].mxu1 }
 0x934   : >> { %v1382_v35 = vadd.f32 %v1381_v33, %v1289_v27  ;;  %v1423_v36 = vadd.f32 %v1422_v34, %v1297_v28  ;;  %v1383_v37 = vpop.f32.mrb[22].mxu0  ;;  %v1424_v38 = vpop.f32.mrb[22].mxu1 }
 0x935   : >> { %v1427_v39 = vmax.f32 %v1380_v31, 0.0  ;;  %v1429_v40 = vmax.f32 %v1421_v32, 0.0  ;;  %v1384_v41 = vpop.f32.mrb[23].mxu0  ;;  %v1425_v42 = vpop.f32.mrb[23].mxu1 }
 0x936   : >> { %v1428_v43 = vmax.f32 %v1382_v35, 0.0  ;;  %v1430_v44 = vmax.f32 %v1423_v36, 0.0 }
 0x937   : >> { %v1431_v47 = vpack.c.bf16 %v1427_v39, %v1427_v39  ;;  %v1433_v48 = vpack.c.bf16 %v1429_v40, %v1429_v40 }
 0x938   : >> { %v1432_v45 = vpack.c.bf16 %v1428_v43, %v1428_v43  ;;  %v1434_v46 = vpack.c.bf16 %v1430_v44, %v1430_v44 }
 0x93a   : >> { %1734 = vmatprep.mubr.bf16.mxu0 %v1432_v45  ;;  %1774 = vmatprep.mubr.bf16.mxu1 %v1434_v46 }
 0x93b   : >> { %1735 = vmatmul.mubr.bf16.vlgmr.msra.gmra.mrb[24].mxu0 %v1431_v47  ;;  %1775 = vmatmul.mubr.bf16.vlgmr.msra.gmra.mrb[24].mxu1 %v1433_v48 }
 0xa0e   : >> { %v2092_v49 = vpop.f32.mrb[24].mxu0  ;;  %v2114_v51 = vpop.f32.mrb[24].mxu1 }
 0xa0f   : >> { %v2093_v53 = vpop.f32.mrb[25].mxu0  ;;  %v2115_v54 = vpop.f32.mrb[25].mxu1 }
 0xa10   : >> { %v2094_v55 = vadd.f32 %v2093_v53, %v2092_v49  ;;  %v2116_v56 = vadd.f32 %v2115_v54, %v2114_v51  ;;  %v2095_v57 = vpop.f32.mrb[26].mxu0  ;;  %v2117_v4 = vpop.f32.mrb[26].mxu1 }
 0xa11   : >> { %v2096_v58 = vpop.f32.mrb[27].mxu0  ;;  %v2118_v59 = vpop.f32.mrb[27].mxu1 }
 0xa12   : >> { %v1737_v60 = vadd.f32 %v2094_v55, %v2009_v52 }
 0xa14   : >> { %v1777_v61 = vadd.f32 %v2116_v56, %v1737_v60 }
 0xa16   : >> { %v1782_v62 = vadd.f32 %v1777_v61, %v2623_v50 }
 0xa18   : >> { %v1787_v63 = vsel %vm613_vm2, %v1782_v62, 0.0 }
 0xa19   : >> { %1788 = vadd.xlane.f32.xlu1 %v1787_v63 }
 0xaa6   : >> { %v1789_v0 = vpop.xlane.xlu1 %1788 }
 0xaa7   : >> { %v1790_v5 = vmul.f32 0.03125, %v1789_v0 }
 0xaa9   : >> { %v1791_v6 = vsub.f32 %v1782_v62, %v1790_v5 }
 0xaab   : >> { %v1792_v7 = vmul.f32 %v1791_v6, %v1791_v6 }
 0xaad   : >> { %v1793_v8 = vsel %vm613_vm2, %v1792_v7, 0.0 }
 0xaae   : >> { %1794 = vadd.xlane.f32.xlu0 %v1793_v8 }
 0xb3b   : >> { %v1795_v9 = vpop.xlane.xlu0 %1794 }
 0xb3c   : >> { %v1796_v10 = vmul.f32 0.03125, %v1795_v9 }
 0xb3e   : >> { %v1797_v11 = vadd.f32 1e-05, %v1796_v10 }
 0xb40   : >> { %2306 = vrsqrt.f32 %v1797_v11 }
 0xb4a   : >> { %v2307_v50 = vpop.eup %2306 }
 0xb4b   : >> { %v1799_v14 = vmul.f32 %v2307_v50, %v1791_v6  ;;  %582 = sbr.rel (!%p580_p4) target bundleno = 20 (0x14), region = 144 }
 0xb4d   : >> { %v1806_v16 = vmul.f32 %v2042_v12, %v1799_v14 }
 0xb4f   : >> { %v1813_v17 = vadd.f32 %v2043_v15, %v1806_v16  }
 0xb51   : >> { %v2726_v3 = vmov %v1813_v17  ;;  %v1814_v20 = vpack.c.bf16 (%p580_p4), %v1813_v17, %v1813_v17 }
 0xb52   : > { %v2351_v3 = vmov 0.0  }
 0xb53   : > { %2187 = vmatprep.subr.bf16.mxu0 %v2351_v3  ;;  %2191 = vmatprep.mubr.msk.bf16.mxu0 %vm2352_vm7, %v2351_v3 }
 0xb54   : > { %2188 = vmatpush3.bf16.msra.mxu0 %v2308_v18 }
 0xb55   : > { %2189 = vmatprep.subr.bf16.mxu0 %v2351_v3 }
 0xb58   : > { %2190 = vmatpush3.bf16.msra.mxu0 %v2309_v19 }
 0xb5b   : > { %2192 = vmatmul.mubr.msk.bf16.vlgmr.msra.gmra.mrb[0].mxu0 %vm613_vm2, %v1814_v20 }
 0xc2e   : > { %v1876_v2 = vpop.f32.mrb[0].mxu0 }
 0xc2f   : > { %v1877_v21 = vadd.f32 %v2044_v1, %v1876_v2  ;;  %v2193_v22 = vpop.f32.mrb[1].mxu0 }
 0xc30   : > { %v1879_v23 = vpop.f32.mrb[2].mxu0 }
 0xc31   : > { %1882 = vst [vmem:[%s2468_s22] sm:$0xff] %v1877_v21  ;;  %v2194_v24 = vpop.f32.mrb[3].mxu0 }
 0xc32 PF: > { %s28_s27 = sadd.s32 1, %s2324_s27  }
 0xc33   : > { %p25_p5 = scmp.ge.s32.totalorder %s28_s27, 4  }
 0xc35   :  { %27 = sbr.rel (!%p25_p5) target bundleno = 4 (0x4), region = 155 }

</bundles_post_ra>
